<compile_context>
chip_gen: v5e
topology: v5e:2x2
jax: 0.10.0
libtpu: 0.0.40
codegen_flags: <defaults>
</compile_context>

<pallas_src>
import math
import functools

import jax
import jax.numpy as jnp
from jax.experimental import pallas as pl
from jax.experimental.pallas import tpu as pltpu


# ----------------------------- in-kernel helpers -----------------------------

def _layer_norm(x, w, b, eps=1e-5):
    mu = jnp.mean(x, axis=-1, keepdims=True)
    var = jnp.mean((x - mu) ** 2, axis=-1, keepdims=True)
    return (x - mu) * jax.lax.rsqrt(var + eps) * w + b


def _gelu(x):
    # exact (erf) GELU, matching the reference implementation
    return 0.5 * x * (1.0 + jax.lax.erf(x / math.sqrt(2.0)))


# ------------------------------ fused encoder kernel --------------------------

def encoder_kernel(emb_ref, pos_ref, bias_ref,
                   wqkv_ref, bqkv_ref, wo_ref, bo_ref,
                   ln1w_ref, ln1b_ref,
                   w1_ref, b1_ref, w2_ref, b2_ref,
                   ln2w_ref, ln2b_ref,
                   o_ref, x_ref,
                   *, num_heads, embed_scale):
    layer = pl.program_id(0)

    # ---- layer 0: fold the embedding math into the fused kernel ----
    @pl.when(layer == 0)
    def _():
        # out = embed_scale * token_emb + positional_emb (dropout at inference = identity)
        x_ref[...] = embed_scale * emb_ref[...] + pos_ref[...][None, :, :]

    x = x_ref[...]                                        # (B, S, D) f32, VMEM-resident
    B, S, D = x.shape
    H = num_heads
    hd = D // H
    scaling = hd ** -0.5
    x2 = x.reshape(B * S, D)

    # ---- multi-head self-attention (weights pre-transposed: y = x @ W) ----
    qkv = jnp.dot(x2, wqkv_ref[0], preferred_element_type=jnp.float32) + bqkv_ref[0]
    qkv = qkv.reshape(B, S, 3 * D)
    q = qkv[:, :, 0 * D:1 * D] * scaling
    k = qkv[:, :, 1 * D:2 * D]
    v = qkv[:, :, 2 * D:3 * D]

    # additive key-padding bias, broadcast hoisted out of the head loop (no per-head
    # broadcast_in_dim: JAX does not CSE it).
    bias = jnp.broadcast_to(bias_ref[...], (B, S, S))     # (B, S, S)
    wo = wo_ref[0]                                        # (D, D), already transposed

    attn_out = jnp.zeros((B * S, D), jnp.float32)
    for h in range(H):                                    # unrolled at trace time (H small)
        sl = slice(h * hd, (h + 1) * hd)
        s = jnp.einsum('bqd,bkd->bqk', q[:, :, sl], k[:, :, sl],
                       preferred_element_type=jnp.float32) + bias      # (B, S, S)
        s = s - jnp.max(s, axis=-1, keepdims=True)
        p = jnp.exp(s)
        p = p * pl.reciprocal(jnp.sum(p, axis=-1, keepdims=True), approx=True)
        ctx = jnp.einsum('bqk,bkd->bqd', p, v[:, :, sl],
                         preferred_element_type=jnp.float32)           # (B, S, hd)
        # fuse the output projection per head: no head-wise concatenate needed
        attn_out = attn_out + jnp.dot(ctx.reshape(B * S, hd), wo[sl, :],
                                      preferred_element_type=jnp.float32)
    attn_out = attn_out + bo_ref[0]

    # ---- post-LN residual block 1 (dropout = identity at inference) ----
    x2 = _layer_norm(x2 + attn_out, ln1w_ref[0], ln1b_ref[0])

    # ---- feed-forward ----
    h1 = _gelu(jnp.dot(x2, w1_ref[0], preferred_element_type=jnp.float32) + b1_ref[0])
    y = jnp.dot(h1, w2_ref[0], preferred_element_type=jnp.float32) + b2_ref[0]
    x2 = _layer_norm(x2 + y, ln2w_ref[0], ln2b_ref[0])

    new_x = x2.reshape(B, S, D)
    x_ref[...] = new_x                                    # carry to the next layer

    @pl.when(layer == pl.num_programs(0) - 1)
    def _():
        o_ref[...] = new_x.astype(o_ref.dtype)


# ------------------------------ pallas wrapper --------------------------------

def run_encoder(emb, pos, bias, lp, num_heads, embed_scale):
    """emb: (B,S,D) f32; pos: (S,D) f32; bias: (B,1,S) f32 additive key-pad bias.
    lp: dict of per-layer weights stacked with a leading L axis (pre-transposed)."""
    B, S, D = emb.shape
    L = lp["wqkv"].shape[0]
    F_ = lp["w1"].shape[2]

    def resident(shape):
        # layer-invariant input: same block every grid step -> fetched once, stays in VMEM
        return pl.BlockSpec(shape, lambda l, _n=len(shape): (0,) * _n)

    def per_layer(*shape):
        # one layer's slice of an (L, *shape) stacked array, streamed per grid step
        return pl.BlockSpec((1,) + tuple(shape),
                            lambda l, _n=len(shape): (l,) + (0,) * _n)

    return pl.pallas_call(
        functools.partial(encoder_kernel, num_heads=num_heads, embed_scale=embed_scale),
        out_shape=jax.ShapeDtypeStruct((B, S, D), jnp.float32),
        grid=(L,),
        in_specs=[
            resident((B, S, D)),                 # token embeddings (both streams stacked on B)
            resident((S, D)),                    # sinusoidal positions
            resident((B, 1, S)),                 # additive key-padding bias
            per_layer(D, 3 * D), per_layer(1, 3 * D),   # in-proj W^T / b
            per_layer(D, D), per_layer(1, D),           # out-proj W^T / b
            per_layer(1, D), per_layer(1, D),           # attn layer-norm w / b
            per_layer(D, F_), per_layer(1, F_),         # fc1 W^T / b
            per_layer(F_, D), per_layer(1, D),          # fc2 W^T / b
            per_layer(1, D), per_layer(1, D),           # ff layer-norm w / b
        ],
        out_specs=pl.BlockSpec((B, S, D), lambda l: (0, 0, 0)),
        scratch_shapes=[pltpu.VMEM((B, S, D), jnp.float32)],
        compiler_params=pltpu.CompilerParams(dimension_semantics=("arbitrary",)),
    )(emb, pos, bias,
      lp["wqkv"], lp["bqkv"], lp["wo"], lp["bo"],
      lp["ln1w"], lp["ln1b"],
      lp["w1"], lp["b1"], lp["w2"], lp["b2"],
      lp["ln2w"], lp["ln2b"])


# ------------------------------- params / glue ---------------------------------

def sinusoidal_pos_embedding(num_positions, dim):
    half = dim // 2
    emb = math.log(10000.0) / (half - 1)
    freqs = jnp.exp(jnp.arange(half, dtype=jnp.float32) * -emb)
    args = jnp.arange(num_positions, dtype=jnp.float32)[:, None] * freqs[None, :]
    table = jnp.concatenate([jnp.sin(args), jnp.cos(args)], axis=1)
    if dim % 2 == 1:
        table = jnp.concatenate([table, jnp.zeros((num_positions, 1), jnp.float32)], axis=1)
    return table                                           # (num_positions, dim)


def init_params(key, vocab_eq, vocab_wd, layers, D, F_, pad_eq, pad_wd):
    ks = jax.random.split(key, 2 + 4 * layers)
    eq_embed = jax.random.normal(ks[0], (vocab_eq, D), jnp.float32) * (D ** -0.5)
    eq_embed = eq_embed.at[pad_eq].set(0.0)                # padding row is zero
    wd_embed = jax.random.normal(ks[1], (vocab_wd, D), jnp.float32) * (D ** -0.5)
    wd_embed = wd_embed.at[pad_wd].set(0.0)

    kw = ks[2:]

    def stack(shape, keys, scale):
        return jnp.stack([jax.random.normal(k, shape, jnp.float32) * scale for k in keys])

    # all matmul weights stored pre-transposed (x @ W layout), stacked over layers.
    # NOTE: only wd_transformer is used in the reference forward (eq_transformer is unused).
    layer_params = dict(
        wqkv=stack((D, 3 * D), kw[0::4], D ** -0.5),
        bqkv=jnp.zeros((layers, 1, 3 * D), jnp.float32),
        wo=stack((D, D), kw[1::4], D ** -0.5),
        bo=jnp.zeros((layers, 1, D), jnp.float32),
        ln1w=jnp.ones((layers, 1, D), jnp.float32),
        ln1b=jnp.zeros((layers, 1, D), jnp.float32),
        w1=stack((D, F_), kw[2::4], D ** -0.5),
        b1=jnp.zeros((layers, 1, F_), jnp.float32),
        w2=stack((F_, D), kw[3::4], F_ ** -0.5),
        b2=jnp.zeros((layers, 1, D), jnp.float32),
        ln2w=jnp.ones((layers, 1, D), jnp.float32),
        ln2b=jnp.zeros((layers, 1, D), jnp.float32),
    )
    return dict(eq_embed=eq_embed, wd_embed=wd_embed, layers=layer_params)


def mono_encoder_forward(input_eq, input_wd, params, pad_eq, pad_wd, num_heads):
    """input_eq: (S_eq, B) int32, input_wd: (S_wd, B) int32.
    Returns (src_repr (S_eq+S_wd, B, D) f32, src_mask (S_eq+S_wd, B) bool)."""
    D = params["eq_embed"].shape[1]
    embed_scale = math.sqrt(D)

    S_eq, B = input_eq.shape
    S_wd, _ = input_wd.shape
    S = max(S_eq, S_wd)            # pad both streams to a common length, stack on batch

    def prep(ids, table, pad_idx):
        S_i, _ = ids.shape
        mask_sb = (ids == pad_idx)                               # (S_i, B) bool
        emb = jnp.take(table, ids.T, axis=0)                     # (B, S_i, D) gather = glue
        bias_row = jnp.where(mask_sb.T, jnp.float32(-1e30), jnp.float32(0.0))   # (B, S_i)
        if S > S_i:
            emb = jnp.pad(emb, ((0, 0), (0, S - S_i), (0, 0)))
            bias_row = jnp.pad(bias_row, ((0, 0), (0, S - S_i)),
                               constant_values=jnp.float32(-1e30))
        return emb, bias_row[:, None, :], mask_sb                # (B,S,D), (B,1,S), (S_i,B)

    emb_eq, bias_eq, eq_mask = prep(input_eq, params["eq_embed"], pad_eq)
    emb_wd, bias_wd, wd_mask = prep(input_wd, params["wd_embed"], pad_wd)
    # F.dropout on the wd embedding with training=False is the identity -> no-op.

    # both streams go through the SAME (wd) transformer -> fuse them into one pallas_call.
    emb = jnp.concatenate([emb_eq, emb_wd], axis=0)              # (2B, S, D)
    bias = jnp.concatenate([bias_eq, bias_wd], axis=0)           # (2B, 1, S)
    pos = sinusoidal_pos_embedding(S, D)                         # (S, D)

    out = run_encoder(emb, pos, bias, params["layers"], num_heads, embed_scale)  # (2B, S, D)

    eq_repr = jnp.transpose(out[:B, :S_eq], (1, 0, 2))           # (S_eq, B, D)
    wd_repr = jnp.transpose(out[B:, :S_wd], (1, 0, 2))           # (S_wd, B, D)

    src_repr = jnp.concatenate([eq_repr, wd_repr], axis=0)
    src_mask = jnp.concatenate([eq_mask, wd_mask], axis=0)
    return src_repr, src_mask


# ------------------------------------ main ------------------------------------

if __name__ == "__main__":
    vocab_eq, pad_eq = 40, 0
    vocab_wd, pad_wd = 60, 0
    layers, embed_dim, ff_embed_dim, num_heads = 2, 32, 64, 4
    S_eq, S_wd, B = 8, 8, 2

    root = jax.random.PRNGKey(0)
    k_param, k_eq, k_wd = jax.random.split(root, 3)

    params = init_params(k_param, vocab_eq, vocab_wd, layers,
                         embed_dim, ff_embed_dim, pad_eq, pad_wd)

    input_eq = jax.random.randint(k_eq, (S_eq, B), 1, vocab_eq, dtype=jnp.int32)
    input_wd = jax.random.randint(k_wd, (S_wd, B), 1, vocab_wd, dtype=jnp.int32)
    input_eq = input_eq.at[-2:, 0].set(pad_eq)             # pad the tail of eq sequence 0
    input_wd = input_wd.at[-3:, 1].set(pad_wd)             # pad the tail of wd sequence 1

    src_repr, src_mask = mono_encoder_forward(
        input_eq, input_wd, params, pad_eq, pad_wd, num_heads)
    jax.block_until_ready((src_repr, src_mask))

    assert src_repr.shape == (S_eq + S_wd, B, embed_dim)
    assert src_mask.shape == (S_eq + S_wd, B)
    assert src_mask.dtype == jnp.bool_
    assert bool(jnp.all(jnp.isfinite(src_repr)))
    print("KERNEL_OK")
</pallas_src>

<mosaic_0001>
module attributes {stable_mosaic.version = 11 : i64} {
  func.func @encoder_kernel(%arg0: i32, %arg1: memref<4x8x32xf32, #tpu.memory_space<vmem>>, %arg2: memref<8x32xf32, #tpu.memory_space<vmem>>, %arg3: memref<4x1x8xf32, #tpu.memory_space<vmem>>, %arg4: memref<1x32x96xf32, #tpu.memory_space<vmem>>, %arg5: memref<1x1x96xf32, #tpu.memory_space<vmem>>, %arg6: memref<1x32x32xf32, #tpu.memory_space<vmem>>, %arg7: memref<1x1x32xf32, #tpu.memory_space<vmem>>, %arg8: memref<1x1x32xf32, #tpu.memory_space<vmem>>, %arg9: memref<1x1x32xf32, #tpu.memory_space<vmem>>, %arg10: memref<1x32x64xf32, #tpu.memory_space<vmem>>, %arg11: memref<1x1x64xf32, #tpu.memory_space<vmem>>, %arg12: memref<1x64x32xf32, #tpu.memory_space<vmem>>, %arg13: memref<1x1x32xf32, #tpu.memory_space<vmem>>, %arg14: memref<1x1x32xf32, #tpu.memory_space<vmem>>, %arg15: memref<1x1x32xf32, #tpu.memory_space<vmem>>, %arg16: memref<4x8x32xf32, #tpu.memory_space<vmem>>, %arg17: memref<4x8x32xf32, #tpu.memory_space<vmem>>) attributes {dimension_semantics = [#tpu.dimension_semantics<arbitrary>], iteration_bounds = array<i64: 2>, scalar_prefetch = 0 : i64, scratch_operands = 1 : i64, tpu.core_type = #tpu.core_type<tc>, window_params = [{pipeline_mode = #tpu.pipeline_mode<synchronous>, transform_indices = @transform_0, window_bounds = array<i64: 4, 8, 32>}, {pipeline_mode = #tpu.pipeline_mode<synchronous>, transform_indices = @transform_1, window_bounds = array<i64: 8, 32>}, {pipeline_mode = #tpu.pipeline_mode<synchronous>, transform_indices = @transform_2, window_bounds = array<i64: 4, 1, 8>}, {transform_indices = @transform_3, window_bounds = array<i64: 1, 32, 96>}, {transform_indices = @transform_4, window_bounds = array<i64: 1, 1, 96>}, {transform_indices = @transform_5, window_bounds = array<i64: 1, 32, 32>}, {transform_indices = @transform_6, window_bounds = array<i64: 1, 1, 32>}, {transform_indices = @transform_7, window_bounds = array<i64: 1, 1, 32>}, {transform_indices = @transform_8, window_bounds = array<i64: 1, 1, 32>}, {transform_indices = @transform_9, window_bounds = array<i64: 1, 32, 64>}, {transform_indices = @transform_10, window_bounds = array<i64: 1, 1, 64>}, {transform_indices = @transform_11, window_bounds = array<i64: 1, 64, 32>}, {transform_indices = @transform_12, window_bounds = array<i64: 1, 1, 32>}, {transform_indices = @transform_13, window_bounds = array<i64: 1, 1, 32>}, {transform_indices = @transform_14, window_bounds = array<i64: 1, 1, 32>}, {pipeline_mode = #tpu.pipeline_mode<synchronous>, transform_indices = @transform_15, window_bounds = array<i64: 4, 8, 32>}]} {
    %c0_i32 = arith.constant 0 : i32
    %0 = arith.cmpi eq, %arg0, %c0_i32 : i32
    %1 = arith.extui %0 : i1 to i32
    %c0_i32_0 = arith.constant 0 : i32
    %2 = arith.cmpi ne, %1, %c0_i32_0 : i32
    scf.if %2 {
      %c0_83 = arith.constant 0 : index
      %c0_84 = arith.constant 0 : index
      %c0_85 = arith.constant 0 : index
      %189 = vector.load %arg1[%c0_83, %c0_84, %c0_85] : memref<4x8x32xf32, #tpu.memory_space<vmem>>, vector<4x8x32xf32>
      %cst_86 = arith.constant 5.65685415 : f32
      %190 = vector.broadcast %cst_86 : f32 to vector<4x8x32xf32>
      %191 = arith.mulf %190, %189 : vector<4x8x32xf32>
      %c0_87 = arith.constant 0 : index
      %c0_88 = arith.constant 0 : index
      %192 = vector.load %arg2[%c0_87, %c0_88] : memref<8x32xf32, #tpu.memory_space<vmem>>, vector<8x32xf32>
      %193 = vector.shape_cast %192 : vector<8x32xf32> to vector<1x8x32xf32>
      %194 = vector.broadcast %193 : vector<1x8x32xf32> to vector<4x8x32xf32>
      %195 = arith.addf %191, %194 : vector<4x8x32xf32>
      %c0_89 = arith.constant 0 : index
      %c0_90 = arith.constant 0 : index
      %c0_91 = arith.constant 0 : index
      %196 = vector.load %arg17[%c0_89, %c0_90, %c0_91] : memref<4x8x32xf32, #tpu.memory_space<vmem>>, vector<4x8x32xf32>
      tpu.vector_store %arg17[%c0_89, %c0_90, %c0_91], %195 {strides = array<i32>} : memref<4x8x32xf32, #tpu.memory_space<vmem>>, vector<4x8x32xf32>,
    } else {
    }
    %c0 = arith.constant 0 : index
    %c0_1 = arith.constant 0 : index
    %c0_2 = arith.constant 0 : index
    %3 = vector.load %arg17[%c0, %c0_1, %c0_2] : memref<4x8x32xf32, #tpu.memory_space<vmem>>, vector<4x8x32xf32>
    %4 = vector.shape_cast %3 : vector<4x8x32xf32> to vector<32x32xf32>
    %c0_3 = arith.constant 0 : index
    %c0_4 = arith.constant 0 : index
    %c0_5 = arith.constant 0 : index
    %5 = vector.load %arg4[%c0_3, %c0_4, %c0_5] : memref<1x32x96xf32, #tpu.memory_space<vmem>>, vector<1x32x96xf32>
    %6 = vector.shape_cast %5 : vector<1x32x96xf32> to vector<32x96xf32>
    %cst = arith.constant dense<0.000000e+00> : vector<32x96xf32>
    %7 = tpu.matmul %4, %6, %cst {dimension_numbers = #tpu.dot_dimension_numbers<[1], [0], [0], [1], [0, 0, 1, 1], [], []>} : vector<32x32xf32>, vector<32x96xf32>, vector<32x96xf32> -> vector<32x96xf32>
    %c0_6 = arith.constant 0 : index
    %c0_7 = arith.constant 0 : index
    %c0_8 = arith.constant 0 : index
    %8 = vector.load %arg5[%c0_6, %c0_7, %c0_8] : memref<1x1x96xf32, #tpu.memory_space<vmem>>, vector<1x1x96xf32>
    %9 = vector.shape_cast %8 : vector<1x1x96xf32> to vector<1x96xf32>
    %10 = vector.broadcast %9 : vector<1x96xf32> to vector<32x96xf32>
    %11 = arith.addf %7, %10 : vector<32x96xf32>
    %12 = vector.shape_cast %11 : vector<32x96xf32> to vector<4x8x96xf32>
    %13 = vector.extract_strided_slice %12 {offsets = [0, 0, 0], sizes = [4, 8, 32], strides = [1, 1, 1]} : vector<4x8x96xf32> to vector<4x8x32xf32>
    %cst_9 = arith.constant 0.353553385 : f32
    %14 = vector.broadcast %cst_9 : f32 to vector<4x8x32xf32>
    %15 = arith.mulf %13, %14 : vector<4x8x32xf32>
    %16 = vector.extract_strided_slice %12 {offsets = [0, 0, 32], sizes = [4, 8, 32], strides = [1, 1, 1]} : vector<4x8x96xf32> to vector<4x8x32xf32>
    %17 = vector.extract_strided_slice %12 {offsets = [0, 0, 64], sizes = [4, 8, 32], strides = [1, 1, 1]} : vector<4x8x96xf32> to vector<4x8x32xf32>
    %c0_10 = arith.constant 0 : index
    %c0_11 = arith.constant 0 : index
    %c0_12 = arith.constant 0 : index
    %18 = vector.load %arg3[%c0_10, %c0_11, %c0_12] : memref<4x1x8xf32, #tpu.memory_space<vmem>>, vector<4x1x8xf32>
    %19 = vector.shape_cast %18 : vector<4x1x8xf32> to vector<4x1x8xf32>
    %20 = vector.broadcast %19 : vector<4x1x8xf32> to vector<4x8x8xf32>
    %c0_13 = arith.constant 0 : index
    %c0_14 = arith.constant 0 : index
    %c0_15 = arith.constant 0 : index
    %21 = vector.load %arg6[%c0_13, %c0_14, %c0_15] : memref<1x32x32xf32, #tpu.memory_space<vmem>>, vector<1x32x32xf32>
    %22 = vector.shape_cast %21 : vector<1x32x32xf32> to vector<32x32xf32>
    %cst_16 = arith.constant 0.000000e+00 : f32
    %23 = vector.broadcast %cst_16 : f32 to vector<32x32xf32>
    %24 = vector.extract_strided_slice %15 {offsets = [0, 0, 0], sizes = [4, 8, 8], strides = [1, 1, 1]} : vector<4x8x32xf32> to vector<4x8x8xf32>
    %25 = vector.extract_strided_slice %16 {offsets = [0, 0, 0], sizes = [4, 8, 8], strides = [1, 1, 1]} : vector<4x8x32xf32> to vector<4x8x8xf32>
    "tpu.trace_start"() <{level = 10 : i32, message = "bqd,bkd->bqk"}> : () -> ()
    %cst_17 = arith.constant dense<0.000000e+00> : vector<4x8x8xf32>
    %26 = tpu.matmul %24, %25, %cst_17 {dimension_numbers = #tpu.dot_dimension_numbers<[2], [2], [1], [1], [0, 0, 0, 1, 1, 1], [0], [0]>} : vector<4x8x8xf32>, vector<4x8x8xf32>, vector<4x8x8xf32> -> vector<4x8x8xf32>
    "tpu.trace_stop"() : () -> ()
    %27 = arith.addf %26, %20 : vector<4x8x8xf32>
    %cst_18 = arith.constant dense<0xFF800000> : vector<4x8xf32>
    %28 = vector.multi_reduction <maximumf>, %27, %cst_18 [2] : vector<4x8x8xf32> to vector<4x8xf32>
    %29 = vector.shape_cast %28 : vector<4x8xf32> to vector<4x8x1xf32>
    %30 = vector.broadcast %29 : vector<4x8x1xf32> to vector<4x8x8xf32>
    %31 = arith.subf %27, %30 : vector<4x8x8xf32>
    %32 = math.exp %31 : vector<4x8x8xf32>
    %cst_19 = arith.constant dense<0.000000e+00> : vector<4x8xf32>
    %33 = vector.multi_reduction <add>, %32, %cst_19 [2] : vector<4x8x8xf32> to vector<4x8xf32>
    %34 = vector.shape_cast %33 : vector<4x8xf32> to vector<4x8x1xf32>
    %35 = tpu.reciprocal %34 {approx = true} : vector<4x8x1xf32> -> vector<4x8x1xf32>
    %36 = vector.broadcast %35 : vector<4x8x1xf32> to vector<4x8x8xf32>
    %37 = arith.mulf %32, %36 : vector<4x8x8xf32>
    %38 = vector.extract_strided_slice %17 {offsets = [0, 0, 0], sizes = [4, 8, 8], strides = [1, 1, 1]} : vector<4x8x32xf32> to vector<4x8x8xf32>
    "tpu.trace_start"() <{level = 10 : i32, message = "bqk,bkd->bqd"}> : () -> ()
    %cst_20 = arith.constant dense<0.000000e+00> : vector<4x8x8xf32>
    %39 = tpu.matmul %37, %38, %cst_20 {dimension_numbers = #tpu.dot_dimension_numbers<[2], [1], [1], [2], [0, 0, 0, 1, 1, 2], [0], [0]>} : vector<4x8x8xf32>, vector<4x8x8xf32>, vector<4x8x8xf32> -> vector<4x8x8xf32>
    "tpu.trace_stop"() : () -> ()
    %40 = vector.shape_cast %39 : vector<4x8x8xf32> to vector<32x8xf32>
    %41 = vector.extract_strided_slice %22 {offsets = [0, 0], sizes = [8, 32], strides = [1, 1]} : vector<32x32xf32> to vector<8x32xf32>
    %cst_21 = arith.constant dense<0.000000e+00> : vector<32x32xf32>
    %42 = tpu.matmul %40, %41, %cst_21 {dimension_numbers = #tpu.dot_dimension_numbers<[1], [0], [0], [1], [0, 0, 1, 1], [], []>} : vector<32x8xf32>, vector<8x32xf32>, vector<32x32xf32> -> vector<32x32xf32>
    %43 = arith.addf %23, %42 : vector<32x32xf32>
    %44 = vector.extract_strided_slice %15 {offsets = [0, 0, 8], sizes = [4, 8, 8], strides = [1, 1, 1]} : vector<4x8x32xf32> to vector<4x8x8xf32>
    %45 = vector.extract_strided_slice %16 {offsets = [0, 0, 8], sizes = [4, 8, 8], strides = [1, 1, 1]} : vector<4x8x32xf32> to vector<4x8x8xf32>
    "tpu.trace_start"() <{level = 10 : i32, message = "bqd,bkd->bqk"}> : () -> ()
    %cst_22 = arith.constant dense<0.000000e+00> : vector<4x8x8xf32>
    %46 = tpu.matmul %44, %45, %cst_22 {dimension_numbers = #tpu.dot_dimension_numbers<[2], [2], [1], [1], [0, 0, 0, 1, 1, 1], [0], [0]>} : vector<4x8x8xf32>, vector<4x8x8xf32>, vector<4x8x8xf32> -> vector<4x8x8xf32>
    "tpu.trace_stop"() : () -> ()
    %47 = arith.addf %46, %20 : vector<4x8x8xf32>
    %cst_23 = arith.constant dense<0xFF800000> : vector<4x8xf32>
    %48 = vector.multi_reduction <maximumf>, %47, %cst_23 [2] : vector<4x8x8xf32> to vector<4x8xf32>
    %49 = vector.shape_cast %48 : vector<4x8xf32> to vector<4x8x1xf32>
    %50 = vector.broadcast %49 : vector<4x8x1xf32> to vector<4x8x8xf32>
    %51 = arith.subf %47, %50 : vector<4x8x8xf32>
    %52 = math.exp %51 : vector<4x8x8xf32>
    %cst_24 = arith.constant dense<0.000000e+00> : vector<4x8xf32>
    %53 = vector.multi_reduction <add>, %52, %cst_24 [2] : vector<4x8x8xf32> to vector<4x8xf32>
    %54 = vector.shape_cast %53 : vector<4x8xf32> to vector<4x8x1xf32>
    %55 = tpu.reciprocal %54 {approx = true} : vector<4x8x1xf32> -> vector<4x8x1xf32>
    %56 = vector.broadcast %55 : vector<4x8x1xf32> to vector<4x8x8xf32>
    %57 = arith.mulf %52, %56 : vector<4x8x8xf32>
    %58 = vector.extract_strided_slice %17 {offsets = [0, 0, 8], sizes = [4, 8, 8], strides = [1, 1, 1]} : vector<4x8x32xf32> to vector<4x8x8xf32>
    "tpu.trace_start"() <{level = 10 : i32, message = "bqk,bkd->bqd"}> : () -> ()
    %cst_25 = arith.constant dense<0.000000e+00> : vector<4x8x8xf32>
    %59 = tpu.matmul %57, %58, %cst_25 {dimension_numbers = #tpu.dot_dimension_numbers<[2], [1], [1], [2], [0, 0, 0, 1, 1, 2], [0], [0]>} : vector<4x8x8xf32>, vector<4x8x8xf32>, vector<4x8x8xf32> -> vector<4x8x8xf32>
    "tpu.trace_stop"() : () -> ()
    %60 = vector.shape_cast %59 : vector<4x8x8xf32> to vector<32x8xf32>
    %61 = vector.extract_strided_slice %22 {offsets = [8, 0], sizes = [8, 32], strides = [1, 1]} : vector<32x32xf32> to vector<8x32xf32>
    %cst_26 = arith.constant dense<0.000000e+00> : vector<32x32xf32>
    %62 = tpu.matmul %60, %61, %cst_26 {dimension_numbers = #tpu.dot_dimension_numbers<[1], [0], [0], [1], [0, 0, 1, 1], [], []>} : vector<32x8xf32>, vector<8x32xf32>, vector<32x32xf32> -> vector<32x32xf32>
    %63 = arith.addf %43, %62 : vector<32x32xf32>
    %64 = vector.extract_strided_slice %15 {offsets = [0, 0, 16], sizes = [4, 8, 8], strides = [1, 1, 1]} : vector<4x8x32xf32> to vector<4x8x8xf32>
    %65 = vector.extract_strided_slice %16 {offsets = [0, 0, 16], sizes = [4, 8, 8], strides = [1, 1, 1]} : vector<4x8x32xf32> to vector<4x8x8xf32>
    "tpu.trace_start"() <{level = 10 : i32, message = "bqd,bkd->bqk"}> : () -> ()
    %cst_27 = arith.constant dense<0.000000e+00> : vector<4x8x8xf32>
    %66 = tpu.matmul %64, %65, %cst_27 {dimension_numbers = #tpu.dot_dimension_numbers<[2], [2], [1], [1], [0, 0, 0, 1, 1, 1], [0], [0]>} : vector<4x8x8xf32>, vector<4x8x8xf32>, vector<4x8x8xf32> -> vector<4x8x8xf32>
    "tpu.trace_stop"() : () -> ()
    %67 = arith.addf %66, %20 : vector<4x8x8xf32>
    %cst_28 = arith.constant dense<0xFF800000> : vector<4x8xf32>
    %68 = vector.multi_reduction <maximumf>, %67, %cst_28 [2] : vector<4x8x8xf32> to vector<4x8xf32>
    %69 = vector.shape_cast %68 : vector<4x8xf32> to vector<4x8x1xf32>
    %70 = vector.broadcast %69 : vector<4x8x1xf32> to vector<4x8x8xf32>
    %71 = arith.subf %67, %70 : vector<4x8x8xf32>
    %72 = math.exp %71 : vector<4x8x8xf32>
    %cst_29 = arith.constant dense<0.000000e+00> : vector<4x8xf32>
    %73 = vector.multi_reduction <add>, %72, %cst_29 [2] : vector<4x8x8xf32> to vector<4x8xf32>
    %74 = vector.shape_cast %73 : vector<4x8xf32> to vector<4x8x1xf32>
    %75 = tpu.reciprocal %74 {approx = true} : vector<4x8x1xf32> -> vector<4x8x1xf32>
    %76 = vector.broadcast %75 : vector<4x8x1xf32> to vector<4x8x8xf32>
    %77 = arith.mulf %72, %76 : vector<4x8x8xf32>
    %78 = vector.extract_strided_slice %17 {offsets = [0, 0, 16], sizes = [4, 8, 8], strides = [1, 1, 1]} : vector<4x8x32xf32> to vector<4x8x8xf32>
    "tpu.trace_start"() <{level = 10 : i32, message = "bqk,bkd->bqd"}> : () -> ()
    %cst_30 = arith.constant dense<0.000000e+00> : vector<4x8x8xf32>
    %79 = tpu.matmul %77, %78, %cst_30 {dimension_numbers = #tpu.dot_dimension_numbers<[2], [1], [1], [2], [0, 0, 0, 1, 1, 2], [0], [0]>} : vector<4x8x8xf32>, vector<4x8x8xf32>, vector<4x8x8xf32> -> vector<4x8x8xf32>
    "tpu.trace_stop"() : () -> ()
    %80 = vector.shape_cast %79 : vector<4x8x8xf32> to vector<32x8xf32>
    %81 = vector.extract_strided_slice %22 {offsets = [16, 0], sizes = [8, 32], strides = [1, 1]} : vector<32x32xf32> to vector<8x32xf32>
    %cst_31 = arith.constant dense<0.000000e+00> : vector<32x32xf32>
    %82 = tpu.matmul %80, %81, %cst_31 {dimension_numbers = #tpu.dot_dimension_numbers<[1], [0], [0], [1], [0, 0, 1, 1], [], []>} : vector<32x8xf32>, vector<8x32xf32>, vector<32x32xf32> -> vector<32x32xf32>
    %83 = arith.addf %63, %82 : vector<32x32xf32>
    %84 = vector.extract_strided_slice %15 {offsets = [0, 0, 24], sizes = [4, 8, 8], strides = [1, 1, 1]} : vector<4x8x32xf32> to vector<4x8x8xf32>
    %85 = vector.extract_strided_slice %16 {offsets = [0, 0, 24], sizes = [4, 8, 8], strides = [1, 1, 1]} : vector<4x8x32xf32> to vector<4x8x8xf32>
    "tpu.trace_start"() <{level = 10 : i32, message = "bqd,bkd->bqk"}> : () -> ()
    %cst_32 = arith.constant dense<0.000000e+00> : vector<4x8x8xf32>
    %86 = tpu.matmul %84, %85, %cst_32 {dimension_numbers = #tpu.dot_dimension_numbers<[2], [2], [1], [1], [0, 0, 0, 1, 1, 1], [0], [0]>} : vector<4x8x8xf32>, vector<4x8x8xf32>, vector<4x8x8xf32> -> vector<4x8x8xf32>
    "tpu.trace_stop"() : () -> ()
    %87 = arith.addf %86, %20 : vector<4x8x8xf32>
    %cst_33 = arith.constant dense<0xFF800000> : vector<4x8xf32>
    %88 = vector.multi_reduction <maximumf>, %87, %cst_33 [2] : vector<4x8x8xf32> to vector<4x8xf32>
    %89 = vector.shape_cast %88 : vector<4x8xf32> to vector<4x8x1xf32>
    %90 = vector.broadcast %89 : vector<4x8x1xf32> to vector<4x8x8xf32>
    %91 = arith.subf %87, %90 : vector<4x8x8xf32>
    %92 = math.exp %91 : vector<4x8x8xf32>
    %cst_34 = arith.constant dense<0.000000e+00> : vector<4x8xf32>
    %93 = vector.multi_reduction <add>, %92, %cst_34 [2] : vector<4x8x8xf32> to vector<4x8xf32>
    %94 = vector.shape_cast %93 : vector<4x8xf32> to vector<4x8x1xf32>
    %95 = tpu.reciprocal %94 {approx = true} : vector<4x8x1xf32> -> vector<4x8x1xf32>
    %96 = vector.broadcast %95 : vector<4x8x1xf32> to vector<4x8x8xf32>
    %97 = arith.mulf %92, %96 : vector<4x8x8xf32>
    %98 = vector.extract_strided_slice %17 {offsets = [0, 0, 24], sizes = [4, 8, 8], strides = [1, 1, 1]} : vector<4x8x32xf32> to vector<4x8x8xf32>
    "tpu.trace_start"() <{level = 10 : i32, message = "bqk,bkd->bqd"}> : () -> ()
    %cst_35 = arith.constant dense<0.000000e+00> : vector<4x8x8xf32>
    %99 = tpu.matmul %97, %98, %cst_35 {dimension_numbers = #tpu.dot_dimension_numbers<[2], [1], [1], [2], [0, 0, 0, 1, 1, 2], [0], [0]>} : vector<4x8x8xf32>, vector<4x8x8xf32>, vector<4x8x8xf32> -> vector<4x8x8xf32>
    "tpu.trace_stop"() : () -> ()
    %100 = vector.shape_cast %99 : vector<4x8x8xf32> to vector<32x8xf32>
    %101 = vector.extract_strided_slice %22 {offsets = [24, 0], sizes = [8, 32], strides = [1, 1]} : vector<32x32xf32> to vector<8x32xf32>
    %cst_36 = arith.constant dense<0.000000e+00> : vector<32x32xf32>
    %102 = tpu.matmul %100, %101, %cst_36 {dimension_numbers = #tpu.dot_dimension_numbers<[1], [0], [0], [1], [0, 0, 1, 1], [], []>} : vector<32x8xf32>, vector<8x32xf32>, vector<32x32xf32> -> vector<32x32xf32>
    %103 = arith.addf %83, %102 : vector<32x32xf32>
    %c0_37 = arith.constant 0 : index
    %c0_38 = arith.constant 0 : index
    %c0_39 = arith.constant 0 : index
    %104 = vector.load %arg7[%c0_37, %c0_38, %c0_39] : memref<1x1x32xf32, #tpu.memory_space<vmem>>, vector<1x1x32xf32>
    %105 = vector.shape_cast %104 : vector<1x1x32xf32> to vector<1x32xf32>
    %106 = vector.broadcast %105 : vector<1x32xf32> to vector<32x32xf32>
    %107 = arith.addf %103, %106 : vector<32x32xf32>
    %108 = arith.addf %4, %107 : vector<32x32xf32>
    %c0_40 = arith.constant 0 : index
    %c0_41 = arith.constant 0 : index
    %c0_42 = arith.constant 0 : index
    %109 = vector.load %arg8[%c0_40, %c0_41, %c0_42] : memref<1x1x32xf32, #tpu.memory_space<vmem>>, vector<1x1x32xf32>
    %110 = vector.shape_cast %109 : vector<1x1x32xf32> to vector<1x32xf32>
    %c0_43 = arith.constant 0 : index
    %c0_44 = arith.constant 0 : index
    %c0_45 = arith.constant 0 : index
    %111 = vector.load %arg9[%c0_43, %c0_44, %c0_45] : memref<1x1x32xf32, #tpu.memory_space<vmem>>, vector<1x1x32xf32>
    %112 = vector.shape_cast %111 : vector<1x1x32xf32> to vector<1x32xf32>
    %cst_46 = arith.constant dense<0.000000e+00> : vector<32xf32>
    %113 = vector.multi_reduction <add>, %108, %cst_46 [1] : vector<32x32xf32> to vector<32xf32>
    %114 = vector.shape_cast %113 : vector<32xf32> to vector<32x1xf32>
    %cst_47 = arith.constant 3.200000e+01 : f32
    %115 = vector.broadcast %cst_47 : f32 to vector<32x1xf32>
    %116 = arith.divf %114, %115 : vector<32x1xf32>
    %117 = vector.broadcast %116 : vector<32x1xf32> to vector<32x32xf32>
    %118 = arith.subf %108, %117 : vector<32x32xf32>
    %119 = arith.mulf %118, %118 : vector<32x32xf32>
    %cst_48 = arith.constant dense<0.000000e+00> : vector<32xf32>
    %120 = vector.multi_reduction <add>, %119, %cst_48 [1] : vector<32x32xf32> to vector<32xf32>
    %121 = vector.shape_cast %120 : vector<32xf32> to vector<32x1xf32>
    %cst_49 = arith.constant 3.200000e+01 : f32
    %122 = vector.broadcast %cst_49 : f32 to vector<32x1xf32>
    %123 = arith.divf %121, %122 : vector<32x1xf32>
    %124 = vector.broadcast %116 : vector<32x1xf32> to vector<32x32xf32>
    %125 = arith.subf %108, %124 : vector<32x32xf32>
    %cst_50 = arith.constant 9.99999974E-6 : f32
    %126 = vector.broadcast %cst_50 : f32 to vector<32x1xf32>
    %127 = arith.addf %123, %126 : vector<32x1xf32>
    %128 = math.rsqrt %127 : vector<32x1xf32>
    %129 = vector.broadcast %128 : vector<32x1xf32> to vector<32x32xf32>
    %130 = arith.mulf %125, %129 : vector<32x32xf32>
    %131 = vector.broadcast %110 : vector<1x32xf32> to vector<32x32xf32>
    %132 = arith.mulf %130, %131 : vector<32x32xf32>
    %133 = vector.broadcast %112 : vector<1x32xf32> to vector<32x32xf32>
    %134 = arith.addf %132, %133 : vector<32x32xf32>
    %c0_51 = arith.constant 0 : index
    %c0_52 = arith.constant 0 : index
    %c0_53 = arith.constant 0 : index
    %135 = vector.load %arg10[%c0_51, %c0_52, %c0_53] : memref<1x32x64xf32, #tpu.memory_space<vmem>>, vector<1x32x64xf32>
    %136 = vector.shape_cast %135 : vector<1x32x64xf32> to vector<32x64xf32>
    %cst_54 = arith.constant dense<0.000000e+00> : vector<32x64xf32>
    %137 = tpu.matmul %134, %136, %cst_54 {dimension_numbers = #tpu.dot_dimension_numbers<[1], [0], [0], [1], [0, 0, 1, 1], [], []>} : vector<32x32xf32>, vector<32x64xf32>, vector<32x64xf32> -> vector<32x64xf32>
    %c0_55 = arith.constant 0 : index
    %c0_56 = arith.constant 0 : index
    %c0_57 = arith.constant 0 : index
    %138 = vector.load %arg11[%c0_55, %c0_56, %c0_57] : memref<1x1x64xf32, #tpu.memory_space<vmem>>, vector<1x1x64xf32>
    %139 = vector.shape_cast %138 : vector<1x1x64xf32> to vector<1x64xf32>
    %140 = vector.broadcast %139 : vector<1x64xf32> to vector<32x64xf32>
    %141 = arith.addf %137, %140 : vector<32x64xf32>
    %cst_58 = arith.constant 5.000000e-01 : f32
    %142 = vector.broadcast %cst_58 : f32 to vector<32x64xf32>
    %143 = arith.mulf %142, %141 : vector<32x64xf32>
    %cst_59 = arith.constant 1.41421354 : f32
    %144 = vector.broadcast %cst_59 : f32 to vector<32x64xf32>
    %145 = arith.divf %141, %144 : vector<32x64xf32>
    %146 = math.erf %145 : vector<32x64xf32>
    %cst_60 = arith.constant 1.000000e+00 : f32
    %147 = vector.broadcast %cst_60 : f32 to vector<32x64xf32>
    %148 = arith.addf %147, %146 : vector<32x64xf32>
    %149 = arith.mulf %143, %148 : vector<32x64xf32>
    %c0_61 = arith.constant 0 : index
    %c0_62 = arith.constant 0 : index
    %c0_63 = arith.constant 0 : index
    %150 = vector.load %arg12[%c0_61, %c0_62, %c0_63] : memref<1x64x32xf32, #tpu.memory_space<vmem>>, vector<1x64x32xf32>
    %151 = vector.shape_cast %150 : vector<1x64x32xf32> to vector<64x32xf32>
    %cst_64 = arith.constant dense<0.000000e+00> : vector<32x32xf32>
    %152 = tpu.matmul %149, %151, %cst_64 {dimension_numbers = #tpu.dot_dimension_numbers<[1], [0], [0], [1], [0, 0, 1, 1], [], []>} : vector<32x64xf32>, vector<64x32xf32>, vector<32x32xf32> -> vector<32x32xf32>
    %c0_65 = arith.constant 0 : index
    %c0_66 = arith.constant 0 : index
    %c0_67 = arith.constant 0 : index
    %153 = vector.load %arg13[%c0_65, %c0_66, %c0_67] : memref<1x1x32xf32, #tpu.memory_space<vmem>>, vector<1x1x32xf32>
    %154 = vector.shape_cast %153 : vector<1x1x32xf32> to vector<1x32xf32>
    %155 = vector.broadcast %154 : vector<1x32xf32> to vector<32x32xf32>
    %156 = arith.addf %152, %155 : vector<32x32xf32>
    %157 = arith.addf %134, %156 : vector<32x32xf32>
    %c0_68 = arith.constant 0 : index
    %c0_69 = arith.constant 0 : index
    %c0_70 = arith.constant 0 : index
    %158 = vector.load %arg14[%c0_68, %c0_69, %c0_70] : memref<1x1x32xf32, #tpu.memory_space<vmem>>, vector<1x1x32xf32>
    %159 = vector.shape_cast %158 : vector<1x1x32xf32> to vector<1x32xf32>
    %c0_71 = arith.constant 0 : index
    %c0_72 = arith.constant 0 : index
    %c0_73 = arith.constant 0 : index
    %160 = vector.load %arg15[%c0_71, %c0_72, %c0_73] : memref<1x1x32xf32, #tpu.memory_space<vmem>>, vector<1x1x32xf32>
    %161 = vector.shape_cast %160 : vector<1x1x32xf32> to vector<1x32xf32>
    %cst_74 = arith.constant dense<0.000000e+00> : vector<32xf32>
    %162 = vector.multi_reduction <add>, %157, %cst_74 [1] : vector<32x32xf32> to vector<32xf32>
    %163 = vector.shape_cast %162 : vector<32xf32> to vector<32x1xf32>
    %cst_75 = arith.constant 3.200000e+01 : f32
    %164 = vector.broadcast %cst_75 : f32 to vector<32x1xf32>
    %165 = arith.divf %163, %164 : vector<32x1xf32>
    %166 = vector.broadcast %165 : vector<32x1xf32> to vector<32x32xf32>
    %167 = arith.subf %157, %166 : vector<32x32xf32>
    %168 = arith.mulf %167, %167 : vector<32x32xf32>
    %cst_76 = arith.constant dense<0.000000e+00> : vector<32xf32>
    %169 = vector.multi_reduction <add>, %168, %cst_76 [1] : vector<32x32xf32> to vector<32xf32>
    %170 = vector.shape_cast %169 : vector<32xf32> to vector<32x1xf32>
    %cst_77 = arith.constant 3.200000e+01 : f32
    %171 = vector.broadcast %cst_77 : f32 to vector<32x1xf32>
    %172 = arith.divf %170, %171 : vector<32x1xf32>
    %173 = vector.broadcast %165 : vector<32x1xf32> to vector<32x32xf32>
    %174 = arith.subf %157, %173 : vector<32x32xf32>
    %cst_78 = arith.constant 9.99999974E-6 : f32
    %175 = vector.broadcast %cst_78 : f32 to vector<32x1xf32>
    %176 = arith.addf %172, %175 : vector<32x1xf32>
    %177 = math.rsqrt %176 : vector<32x1xf32>
    %178 = vector.broadcast %177 : vector<32x1xf32> to vector<32x32xf32>
    %179 = arith.mulf %174, %178 : vector<32x32xf32>
    %180 = vector.broadcast %159 : vector<1x32xf32> to vector<32x32xf32>
    %181 = arith.mulf %179, %180 : vector<32x32xf32>
    %182 = vector.broadcast %161 : vector<1x32xf32> to vector<32x32xf32>
    %183 = arith.addf %181, %182 : vector<32x32xf32>
    %184 = vector.shape_cast %183 : vector<32x32xf32> to vector<4x8x32xf32>
    %c0_79 = arith.constant 0 : index
    %c0_80 = arith.constant 0 : index
    %c0_81 = arith.constant 0 : index
    %185 = vector.load %arg17[%c0_79, %c0_80, %c0_81] : memref<4x8x32xf32, #tpu.memory_space<vmem>>, vector<4x8x32xf32>
    tpu.vector_store %arg17[%c0_79, %c0_80, %c0_81], %184 {strides = array<i32>} : memref<4x8x32xf32, #tpu.memory_space<vmem>>, vector<4x8x32xf32>,
    %c1_i32 = arith.constant 1 : i32
    %186 = arith.cmpi eq, %arg0, %c1_i32 : i32
    %187 = arith.extui %186 : i1 to i32
    %c0_i32_82 = arith.constant 0 : i32
    %188 = arith.cmpi ne, %187, %c0_i32_82 : i32
    scf.if %188 {
      %c0_83 = arith.constant 0 : index
      %c0_84 = arith.constant 0 : index
      %c0_85 = arith.constant 0 : index
      %189 = vector.load %arg16[%c0_83, %c0_84, %c0_85] : memref<4x8x32xf32, #tpu.memory_space<vmem>>, vector<4x8x32xf32>
      tpu.vector_store %arg16[%c0_83, %c0_84, %c0_85], %184 {strides = array<i32>} : memref<4x8x32xf32, #tpu.memory_space<vmem>>, vector<4x8x32xf32>,
    } else {
    }
    return
  }
  func.func @transform_0(%arg0: i32) -> (i32, i32, i32) {
    %c0_i32 = arith.constant 0 : i32
    %c0_i32_0 = arith.constant 0 : i32
    %c0_i32_1 = arith.constant 0 : i32
    %c0_i32_2 = arith.constant 0 : i32
    return %c0_i32, %c0_i32_0, %c0_i32_1 : i32, i32, i32
  }
  func.func @transform_1(%arg0: i32) -> (i32, i32) {
    %c0_i32 = arith.constant 0 : i32
    %c0_i32_0 = arith.constant 0 : i32
    %c0_i32_1 = arith.constant 0 : i32
    return %c0_i32, %c0_i32_0 : i32, i32
  }
  func.func @transform_2(%arg0: i32) -> (i32, i32, i32) {
    %c0_i32 = arith.constant 0 : i32
    %c0_i32_0 = arith.constant 0 : i32
    %c0_i32_1 = arith.constant 0 : i32
    %c0_i32_2 = arith.constant 0 : i32
    return %c0_i32, %c0_i32_0, %c0_i32_1 : i32, i32, i32
  }
  func.func @transform_3(%arg0: i32) -> (i32, i32, i32) {
    %c0_i32 = arith.constant 0 : i32
    %c0_i32_0 = arith.constant 0 : i32
    %c0_i32_1 = arith.constant 0 : i32
    return %arg0, %c0_i32, %c0_i32_0 : i32, i32, i32
  }
  func.func @transform_4(%arg0: i32) -> (i32, i32, i32) {
    %c0_i32 = arith.constant 0 : i32
    %c0_i32_0 = arith.constant 0 : i32
    %c0_i32_1 = arith.constant 0 : i32
    return %arg0, %c0_i32, %c0_i32_0 : i32, i32, i32
  }
  func.func @transform_5(%arg0: i32) -> (i32, i32, i32) {
    %c0_i32 = arith.constant 0 : i32
    %c0_i32_0 = arith.constant 0 : i32
    %c0_i32_1 = arith.constant 0 : i32
    return %arg0, %c0_i32, %c0_i32_0 : i32, i32, i32
  }
  func.func @transform_6(%arg0: i32) -> (i32, i32, i32) {
    %c0_i32 = arith.constant 0 : i32
    %c0_i32_0 = arith.constant 0 : i32
    %c0_i32_1 = arith.constant 0 : i32
    return %arg0, %c0_i32, %c0_i32_0 : i32, i32, i32
  }
  func.func @transform_7(%arg0: i32) -> (i32, i32, i32) {
    %c0_i32 = arith.constant 0 : i32
    %c0_i32_0 = arith.constant 0 : i32
    %c0_i32_1 = arith.constant 0 : i32
    return %arg0, %c0_i32, %c0_i32_0 : i32, i32, i32
  }
  func.func @transform_8(%arg0: i32) -> (i32, i32, i32) {
    %c0_i32 = arith.constant 0 : i32
    %c0_i32_0 = arith.constant 0 : i32
    %c0_i32_1 = arith.constant 0 : i32
    return %arg0, %c0_i32, %c0_i32_0 : i32, i32, i32
  }
  func.func @transform_9(%arg0: i32) -> (i32, i32, i32) {
    %c0_i32 = arith.constant 0 : i32
    %c0_i32_0 = arith.constant 0 : i32
    %c0_i32_1 = arith.constant 0 : i32
    return %arg0, %c0_i32, %c0_i32_0 : i32, i32, i32
  }
  func.func @transform_10(%arg0: i32) -> (i32, i32, i32) {
    %c0_i32 = arith.constant 0 : i32
    %c0_i32_0 = arith.constant 0 : i32
    %c0_i32_1 = arith.constant 0 : i32
    return %arg0, %c0_i32, %c0_i32_0 : i32, i32, i32
  }
  func.func @transform_11(%arg0: i32) -> (i32, i32, i32) {
    %c0_i32 = arith.constant 0 : i32
    %c0_i32_0 = arith.constant 0 : i32
    %c0_i32_1 = arith.constant 0 : i32
    return %arg0, %c0_i32, %c0_i32_0 : i32, i32, i32
  }
  func.func @transform_12(%arg0: i32) -> (i32, i32, i32) {
    %c0_i32 = arith.constant 0 : i32
    %c0_i32_0 = arith.constant 0 : i32
    %c0_i32_1 = arith.constant 0 : i32
    return %arg0, %c0_i32, %c0_i32_0 : i32, i32, i32
  }
  func.func @transform_13(%arg0: i32) -> (i32, i32, i32) {
    %c0_i32 = arith.constant 0 : i32
    %c0_i32_0 = arith.constant 0 : i32
    %c0_i32_1 = arith.constant 0 : i32
    return %arg0, %c0_i32, %c0_i32_0 : i32, i32, i32
  }
  func.func @transform_14(%arg0: i32) -> (i32, i32, i32) {
    %c0_i32 = arith.constant 0 : i32
    %c0_i32_0 = arith.constant 0 : i32
    %c0_i32_1 = arith.constant 0 : i32
    return %arg0, %c0_i32, %c0_i32_0 : i32, i32, i32
  }
  func.func @transform_15(%arg0: i32) -> (i32, i32, i32) {
    %c0_i32 = arith.constant 0 : i32
    %c0_i32_0 = arith.constant 0 : i32
    %c0_i32_1 = arith.constant 0 : i32
    %c0_i32_2 = arith.constant 0 : i32
    return %c0_i32, %c0_i32_0, %c0_i32_1 : i32, i32, i32
  }
}

</mosaic_0001>

<bundles_post_ra>
// kernel: tpu_custom_call.1
= control target key start
LH: loop header
LB: loop body
LE: loop exit
PB: predicated region body
PF: predicated region fallthrough
CT: control target
= control target key end

     0   :  { %s4253_s0 = inlined_call_operand.hbm [shape: f32[4,8,32], index: 0, kind: input, shape index: {}]   ;;  %s4254_s1 = inlined_call_operand.hbm [shape: f32[8,32], index: 1, kind: input, shape index: {}]   ;;  %s4255_s2 = inlined_call_operand.hbm [shape: f32[4,1,8], index: 2, kind: input, shape index: {}]   ;;  %s4256_s3 = inlined_call_operand.vmem [shape: f32[2,32,96], index: 3, kind: input, shape index: {}]   ;;  %s4257_s4 = inlined_call_operand.vmem [shape: f32[2,1,96], index: 4, kind: input, shape index: {}]   ;;  %s4258_s5 = inlined_call_operand.vmem [shape: f32[2,32,32], index: 5, kind: input, shape index: {}]   ;;  %s4259_s6 = inlined_call_operand.vmem [shape: f32[2,1,32], index: 6, kind: input, shape index: {}]   ;;  %s4260_s7 = inlined_call_operand.hbm [shape: f32[2,1,32], index: 7, kind: input, shape index: {}]   ;;  %s4261_s8 = inlined_call_operand.hbm [shape: f32[2,1,32], index: 8, kind: input, shape index: {}]   ;;  %s4262_s9 = inlined_call_operand.vmem [shape: f32[2,32,64], index: 9, kind: input, shape index: {}]   ;;  %s4263_s10 = inlined_call_operand.vmem [shape: f32[2,1,64], index: 10, kind: input, shape index: {}]   ;;  %s4264_s11 = inlined_call_operand.vmem [shape: f32[2,64,32], index: 11, kind: input, shape index: {}]   ;;  %s4265_s12 = inlined_call_operand.vmem [shape: f32[2,1,32], index: 12, kind: input, shape index: {}]   ;;  %s4266_s13 = inlined_call_operand.vmem [shape: f32[2,1,32], index: 13, kind: input, shape index: {}]   ;;  %s4267_s14 = inlined_call_operand.hbm [shape: f32[2,1,32], index: 14, kind: input, shape index: {}]   ;;  %s4268_s15 = inlined_call_operand.hbm [shape: f32[4,8,32], index: 15, kind: output, shape index: {}]  }
   0x1   :  { %4272 = sst [smem:[#allocation23_spill]] %s4253_s0 }
   0x2   :  { %4273 = sst [smem:[#allocation24_spill]] %s4254_s1 }
   0x3   :  { %4274 = sst [smem:[#allocation25_spill]] %s4255_s2 }
   0x4   :  { %4275 = sst [smem:[#allocation26_spill]] %s4256_s3 }
   0x5   :  { %4276 = sst [smem:[#allocation27_spill]] %s4258_s5 }
   0x6   :  { %4277 = sst [smem:[#allocation28_spill]] %s4260_s7 }
   0x7   :  { %4278 = sst [smem:[#allocation29_spill]] %s4262_s9 }
   0x8   :  { %4279 = sst [smem:[#allocation30_spill]] %s4263_s10 }
   0x9   :  { %4280 = sst [smem:[#allocation31_spill]] %s4264_s11 }
   0xa   :  { %4281 = sst [smem:[#allocation32_spill]] %s4265_s12 }
   0xb   :  { %4282 = sst [smem:[#allocation33_spill]] %s4266_s13 }
   0xc   :  { %4283 = sst [smem:[#allocation34_spill]] %s4268_s15 }
   0xd   :  { %20 = vsyncpa [#allocation4], 0 }
   0xe   :  { %21 = vsyncpa [#allocation7], 0 }
   0xf   :  { %22 = vsyncpa [#allocation10], 0 }
  0x10   :  { %24 = vsyncpa [#allocation10 + $0x1], 0 }
  0x11   :  { %25 = vsyncpa [#allocation13], 0 }
  0x12   :  { %27 = vsyncpa [#allocation13 + $0x1], 0 }
  0x13   :  { %28 = vsyncpa [#allocation5], 0  ;;  %s3528_s18 = smov 0   ;;  %s3530_s19 = smov 0  }
  0x14   :  { %s3532_s20 = smov 0   ;;  %s3534_s21 = smov 0  }
  0x15 LB: > { %4284 = sst [smem:[#allocation20_spill]] %s3419_s20  ;;  %s3547_s22 = sadd.s32 4294967295, %s3423_s21   ;;  %s3423_s21 = sphi %s3534_s21, %s4311_s21   ;;  %s3419_s20 = sphi %s3532_s20, %s4313_s20   ;;  %s3415_s19 = sphi %s3530_s19, %s4315_s19   ;;  %s3411_s18 = sphi %s3528_s18, %s4314_s18  }
  0x16   : > { %p221_p0 = scmp.ne.s32.totalorder %s3415_s19, %s3411_s18  ;;  %p222_p1 = scmp.eq.s32.totalorder %s3547_s22, 0 }
  0x17   : > { %p2820_p2 = scmp.ge.s32.totalorder %s3423_s21, 1  ;;  %p435_p3 = scmp.lt.s32.totalorder %s3423_s21, 3 }
  0x18   : > { %p2821_p4 = scmp.ne.s32.totalorder %s3547_s22, 0  ;;  %p3556_p5 = por %p222_p1, %p221_p0 }
  0x19   : > { %s4286_s1 = sld [smem:[#allocation24_spill]]  ;;  %p3563_p6 = pnand %p2820_p2, %p435_p3 }
  0x1a   : > { %s3425_s28 = smov [#allocation6]   ;;  %s3576_s16 = sadd.s32 1, %s3423_s21  }
  0x1b   : > { %p2950_p7 = pneg %p3563_p6  ;;  %s463_s29 = sshll.u32 %s3425_s28, 4  ;;  %s464_s29 = int_to_ptr.vmem [resolvable:$true] %s463_s29 }
  0x1c   : > { %4289 = sst [smem:[#allocation21_spill]] %s3576_s16  ;;  %s208_s17 = sadd.s32 1, %s3419_s20 }
  0x1d   : > { %p3571_p8 = pnand %p2950_p7, %p222_p1  ;;  %s205_s18 = ssub.s32 %s3423_s21, %s3576_s16 }
  0x1e   : > { %p206_p9 = scmp.eq.s32.totalorder %s205_s18, 0  ;;  %p215_p10 = scmp.ne.s32.totalorder %s3419_s20, %s3415_s19 }
  0x1f   : > { %s461_s26 = sshll.u32 %s4286_s1, 4  ;;  %p216_p11 = scmp.eq.s32.totalorder %s3423_s21, 0  ;;  %s462_s26 = int_to_ptr.hbm [resolvable:$true] %s461_s26 }
  0x20   : > { %2956 = dma.hbm_to_vmem [thread:$0]  (!%p3571_p8), %s462_s26, 128, %s464_s29, [#allocation7]  }
  0x21   : > { %p2973_p12 = scmp.lt.s32.totalorder %s3423_s21, 2  ;;  %p217_p13 = por %p216_p11, %p215_p10 }
  0x22   : > { %s3588_s24 = scalar_select %p206_p9, %s3419_s20, %s208_s17  }
  0x23   : > { %s516_s25 = sand.u32 1, %s3423_s21   ;;  %s3592_s28 = sand.u32 1, %s3419_s20  }
  0x24   : > { %4290 = sst [smem:[#allocation22_spill]] %s3588_s24  ;;  %s519_s11 = scalar_lea.vmem [#allocation9], %s3592_s28 }
  0x25   : > { %s4291_s7 = sld [smem:[#allocation28_spill]]  ;;  %s526_s16 = sshll.u32 %s519_s11, 4  ;;  %s527_s16 = int_to_ptr.vmem [resolvable:$true] %s526_s16 }
  0x26   : > { %p3599_p0 = pnand %p2973_p12, %p217_p13  ;;  %s4293_s0 = sld [smem:[#allocation23_spill]] }
  0x27   : > { %s3426_s24 = smov [#allocation3]   ;;  %s3606_s15 = scalar_lea.sflag [#allocation10], %s516_s25 }
  0x28   : > { %s448_s1 = sshll.u32 %s3426_s24, 4  ;;  %p3199_p3 = pneg %p3599_p0  ;;  %s449_s1 = int_to_ptr.vmem [resolvable:$true] %s448_s1 }
  0x2b   : > { %s522_s13 = scalar_lea.hbm %s4291_s7, %s3423_s21  ;;  %s3202_s17 = scalar_lea.hbm %s4291_s7, 2 }
  0x2c   : > { %s524_s12 = sshll.u32 %s522_s13, 4  ;;  %s446_s18 = sshll.u32 %s4293_s0, 4  ;;  %s525_s12 = int_to_ptr.hbm [resolvable:$true] %s524_s12  ;;  %s447_s18 = int_to_ptr.hbm [resolvable:$true] %s446_s18 }
  0x2d   : > { %s3195_s13 = sshra.s32 %s525_s12, 4  ;;  %s3196_s13 = int_to_ptr.hbm [resolvable:$true] %s3195_s13 }
  0x2e   : > { %s3197_s11 = scalar_lea.hbm %s3196_s13, 1  ;;  %p3203_p10 = scmp.lt.s32.totalorder %s3196_s13, %s4291_s7 }
  0x2f   : > { %p3198_p2 = scmp.ne.s32.totalorder %s3196_s13, %s3197_s11  ;;  %p3204_p11 = scmp.lt.s32.totalorder %s3202_s17, %s3197_s11 }
  0x31   : > { %p3200_p7 = pnand %p3199_p3, %p3198_p2  ;;  %p3205_p12 = por %p3204_p11, %p3203_p10 }
  0x33   : > { %p3201_p9 = pneg %p3200_p7 }
  0x35   : > { %p3206_p13 = pnand %p3205_p12, %p3201_p9 }
  0x37   : > { %3209 = shalt.err (!%p3206_p13)
}
  0x38   : > { %2963 = dma.hbm_to_vmem [thread:$0]  (!%p3599_p0), %s525_s12, 16, %s527_s16, %s3606_s15  }
  0x39   : > { %s4294_s2 = sld [smem:[#allocation25_spill]]  ;;  %s3427_s29 = smov 128  }
  0x3a   : > { %s3428_s0 = smov 8   ;;  %s3429_s10 = smov [#allocation8]  }
  0x3b   : > { %2953 = dma.hbm_to_vmem [thread:$0]  (!%p3571_p8), %s447_s18, 512, %s449_s1, [#allocation4], %s3427_s29, %s3427_s29, %s3428_s0  }
  0x3c   : > { %s474_s13 = sshll.u32 %s3429_s10, 4  ;;  %s3430_s11 = smov 16   ;;  %s475_s13 = int_to_ptr.vmem [resolvable:$true] %s474_s13 }
  0x3d   : > { %s3431_s17 = smov 1   ;;  %s539_s16 = scalar_lea.hbm %s4261_s8, %s3423_s21 }
  0x3e   : > { %s541_s9 = sshll.u32 %s539_s16, 4  ;;  %s536_s24 = scalar_lea.vmem [#allocation11], %s3592_s28  ;;  %s542_s9 = int_to_ptr.hbm [resolvable:$true] %s541_s9 }
  0x3f   : > { %s472_s25 = sshll.u32 %s4294_s2, 4  ;;  %s543_s20 = sshll.u32 %s536_s24, 4  ;;  %s473_s25 = int_to_ptr.hbm [resolvable:$true] %s472_s25  ;;  %s544_s20 = int_to_ptr.vmem [resolvable:$true] %s543_s20 }
  0x40   : > { %2959 = dma.hbm_to_vmem [thread:$0]  (!%p3571_p8), %s473_s25, 64, %s475_s13, [#allocation7], %s3430_s11, %s3430_s11, %s3431_s17  }
  0x41   : > { %s3285_s2 = sshra.s32 %s542_s9, 4  ;;  %s3292_s25 = scalar_lea.hbm %s4261_s8, 2  ;;  %s3286_s2 = int_to_ptr.hbm [resolvable:$true] %s3285_s2 }
  0x42   : > { %s3287_s18 = scalar_lea.hbm %s3286_s2, 1  ;;  %p3293_p8 = scmp.lt.s32.totalorder %s3286_s2, %s4261_s8 }
  0x43   : > { %p3288_p2 = scmp.ne.s32.totalorder %s3286_s2, %s3287_s18  ;;  %p3294_p10 = scmp.lt.s32.totalorder %s3292_s25, %s3287_s18 }
  0x45   : > { %p3290_p7 = pnand %p3288_p2, %p3199_p3  ;;  %p3295_p11 = por %p3294_p10, %p3293_p8 }
  0x47   : > { %p3291_p9 = pneg %p3290_p7 }
  0x49   : > { %p3296_p12 = pnand %p3295_p11, %p3291_p9 }
  0x4b   : > { %3299 = shalt.err (!%p3296_p12)
}
  0x4c   : > { %2966 = dma.hbm_to_vmem [thread:$0]  (!%p3599_p0), %s542_s9, 16, %s544_s20, %s3606_s15  }
  0x4d   : > { %s590_s13 = scalar_lea.hbm %s4267_s14, %s3423_s21  ;;  %s587_s11 = scalar_lea.vmem [#allocation12], %s3592_s28 }
  0x4e   : > { %s594_s17 = sshll.u32 %s587_s11, 4  ;;  %s592_s12 = sshll.u32 %s590_s13, 4  ;;  %s595_s17 = int_to_ptr.vmem [resolvable:$true] %s594_s17  ;;  %s593_s12 = int_to_ptr.hbm [resolvable:$true] %s592_s12 }
  0x4f   : > { %s585_s2 = scalar_lea.sflag [#allocation13], %s3592_s28  ;;  %s3315_s16 = sshra.s32 %s593_s12, 4  ;;  %s3316_s16 = int_to_ptr.hbm [resolvable:$true] %s3315_s16 }
  0x50   : > { %s3317_s24 = scalar_lea.hbm %s3316_s16, 1  ;;  %s3322_s15 = scalar_lea.hbm %s4267_s14, 2 }
  0x51   : > { %p3318_p13 = scmp.ne.s32.totalorder %s3316_s16, %s3317_s24  ;;  %p3323_p9 = scmp.lt.s32.totalorder %s3316_s16, %s4267_s14 }
  0x52   : > { %p3324_p8 = scmp.lt.s32.totalorder %s3322_s15, %s3317_s24 }
  0x53   : > { %p3320_p2 = pnand %p3318_p13, %p3199_p3 }
  0x54   : > { %p3325_p10 = por %p3324_p8, %p3323_p9 }
  0x55   : > { %p3321_p7 = pneg %p3320_p2 }
  0x57   : > { %p3326_p11 = pnand %p3325_p10, %p3321_p7 }
  0x59   : > { %3329 = shalt.err (!%p3326_p11)
}
  0x5a   : > { %2969 = dma.hbm_to_vmem [thread:$0]  (!%p3599_p0), %s593_s12, 16, %s595_s17, %s585_s2  }
  0x5b   : > { %603 = sbr.rel (%p3563_p6) target bundleno = 3386 (0xd3a), region = 80 }
  0x60   : > { %3390 = dma.done.wait (%p222_p1), [#allocation4], 512  }
  0x61   : > { %3392 = vsyncadd (%p222_p1), [#allocation4], 4294966784 }
  0x62   : > { %3394 = dma.done.wait (%p222_p1), [#allocation7], 192  }
  0x63   : > { %3396 = vsyncadd (%p222_p1), [#allocation7], 4294967104  ;;  %s620_s28 = sand.u32 1, %s3547_s22   ;;  %s3675_s26 = sand.u32 1, %s3415_s19  }
  0x64   : > { %s621_s27 = scalar_lea.sflag [#allocation10], %s620_s28 }
  0x65   : > { %3398 = dma.done.wait (%p3556_p5), %s621_s27, 32  }
  0x66   : > { %3400 = vsyncadd (%p3556_p5), %s621_s27, 4294967264  ;;  %s639_s25 = scalar_lea.sflag [#allocation13], %s3675_s26 }
  0x67   : > { %3402 = dma.done.wait (%p3556_p5), %s639_s25, 16  }
  0x68   : > { %3404 = vsyncadd (%p3556_p5), %s639_s25, 4294967280  ;;  %p726_p1 = scmp.lt.s32.totalorder %s3547_s22, 1  ;;  %s4295_s3 = sld [smem:[#allocation26_spill]] }
  0x69   : > { %s4296_s5 = sld [smem:[#allocation27_spill]] }
  0x6a   : > { %s3691_s7 = scalar_select %p726_p1, %s3547_s22, 1 }
  0x6b   : > { %s4297_s28 = sld [smem:[#allocation29_spill]] }
  0x6c   : > { %s2923_s0 = sshll.u32 %s3691_s7, 5  ;;  %s4298_s13 = sld [smem:[#allocation30_spill]] }
  0x6d   : > { %s2926_s23 = sshll.u32 %s3691_s7, 6  ;;  %s4299_s1 = sld [smem:[#allocation31_spill]] }
  0x6e   : > { %s3701_s12 = scalar_lea.vmem %s4295_s3, %s2923_s0  ;;  %s4300_s3 = sld [smem:[#allocation32_spill]] }
  0x6f   : > { %s3706_s24 = scalar_lea.vmem %s4296_s5, %s2923_s0  ;;  %s4301_s5 = sld [smem:[#allocation33_spill]] }
  0x71   : > { %s3715_s27 = scalar_lea.vmem %s4297_s28, %s2923_s0  ;;  %764 = sbr.rel (%p2821_p4) target bundleno = 127 (0x7f), region = 108 }
  0x72   : > { %s749_s17 = scalar_lea.vmem %s4298_s13, %s3691_s7 }
  0x73   : > { %s3725_s2 = scalar_lea.vmem %s4299_s1, %s2926_s23 }
  0x74   : > { %s757_s18 = scalar_lea.vmem %s4300_s3, %s3691_s7 }
  0x75   : > { %s760_s20 = scalar_lea.vmem %s4301_s5, %s3691_s7 }
  0x76   : > { %v765_v0 = vld [vmem:[#allocation3] sm:$0xff]  ;;  %v766_v2 = vld [vmem:[#allocation3 + $0x8] sm:$0xff]  ;;  %v767_v5 = vld [vmem:[#allocation3 + $0x10] sm:$0xff]  ;;  %vm778_vm0 = vcmask 261120  }
  0x77   : > { %v773_v1 = vld [vmem:[#allocation6] sm:$0xff]  ;;  %v769_v3 = vmul.f32 5.656854, %v765_v0  ;;  %v770_v4 = vmul.f32 5.656854, %v766_v2  ;;  %v768_v6 = vld [vmem:[#allocation3 + $0x18] sm:$0xff] }
  0x78   : > { %v771_v7 = vmul.f32 5.656854, %v767_v5  ;;  %v772_v8 = vmul.f32 5.656854, %v768_v6 }
  0x79   : > { %v774_v9 = vadd.f32 %v773_v1, %v769_v3  ;;  %v775_v10 = vadd.f32 %v773_v1, %v770_v4 }
  0x7a   : > { %v776_v11 = vadd.f32 %v773_v1, %v771_v7  ;;  %v777_v12 = vadd.f32 %v773_v1, %v772_v8 }
  0x7b   : > { %779 = vst.msk [vmem:[#allocation2] sm:$0xff] %vm778_vm0, %v774_v9 }
  0x7c   : > { %780 = vst.msk [vmem:[#allocation2 + $0x8] sm:$0xff] %vm778_vm0, %v775_v10 }
  0x7d   : > { %781 = vst.msk [vmem:[#allocation2 + $0x10] sm:$0xff] %vm778_vm0, %v776_v11 }
  0x7e   : > { %782 = vst.msk [vmem:[#allocation2 + $0x18] sm:$0xff] %vm778_vm0, %v777_v12 }
  0x7f PF: > { %v790_v13 = vld [vmem:[%s3701_s12 + $0x18] sm:$0xff]  ;;  %v789_v14 = vld [vmem:[%s3701_s12 + $0x10] sm:$0xff]  ;;  %v788_v15 = vld [vmem:[%s3701_s12 + $0x8] sm:$0xff]  ;;  %vm795_vm1 = vcmask 261120   ;;  %s4302_s1 = scalar_lea.vmem %s4257_s4, %s3691_s7  ;;  %s3432_s30 = smov 96   ;;  %vm864_vm2 = vcmask 64512  }
  0x80   : > { %820 = vmatpush.msra.mxu0 %v790_v13  ;;  %v787_v16 = vld [vmem:[%s3701_s12] sm:$0xff]  ;;  %v3792_v38 = vld [vmem:[#allocation8] ss:$0 sm:$0xff]  ;;  %v3796_v42 = vld [vmem:[#allocation8 + $0x1] ss:$0 sm:$0xff]  ;;  %s3433_s29 = smov 64   ;;  %s4303_s16 = scalar_lea.vmem %s4259_s6, %s3691_s7 }
  0x81   : > { %v3059_v21 = vld [vmem:[%s4302_s1] ss:$0 sm:$0xff]  ;;  %v3800_v46 = vld [vmem:[#allocation8 + $0x3] ss:$0 sm:$0xff]  ;;  %s3434_s0 = smov 88   ;;  %s3435_s11 = smov 120  }
  0x82   : > { %821 = vmatpush.msra.mxu0 %v789_v14  ;;  %v3741_v17 = vld [vmem:[#allocation2] sm:$0xff]  ;;  %v3816_v52 = vld [vmem:[#allocation8 + $0x2] ss:$0 sm:$0xff]  ;;  %s3436_s12 = smov 56   ;;  %s3437_s15 = smov 112  }
  0x83   : > { %v3745_v18 = vld [vmem:[#allocation2 + $0x8] sm:$0xff]  ;;  %s3438_s21 = smov 80   ;;  %s3439_s28 = smov 104  }
  0x84   : > { %822 = vmatpush.msra.mxu0 %v788_v15  ;;  %v785_v19 = vld [vmem:[#allocation2 + $0x10] sm:$0xff]  ;;  %s3440_s25 = smov 72   ;;  %s3441_s10 = smov 48  }
  0x85   : > { %v786_v20 = vld [vmem:[#allocation2 + $0x18] sm:$0xff]  ;;  %s3442_s13 = smov 40   ;;  %s4305_s9 = scalar_lea.vmem [#allocation11], %s3675_s26 }
  0x86   : > { %823 = vmatpush.msra.mxu0 %v787_v16  ;;  %p2918_p4 = scmp.ne.s32.totalorder %s3547_s22, 1 }
  0x87   : > { %2838 = vmatmul.msk.f32.vlgmr.msra.gmra.mxu0 %vm795_vm1, %v3741_v17 }
  0x8f   : > { %2839 = vmatmul.msk.f32.gmra.mxu0 %vm795_vm1, %v3745_v18 }
  0x97   : > { %2840 = vmatmul.msk.f32.gmra.mxu0 %vm795_vm1, %v785_v19 }
  0x9f   : > { %2841 = vmatmul.msk.f32.gmra.mxu0 %vm795_vm1, %v786_v20 }
 0x104   : > { %v825_v22 = vpop.f32.mrf.mxu0 }
 0x105   : > { %v3756_v23 = vadd.f32 %v3059_v21, %v825_v22 }
 0x107   : > { %862 = vrot.lane.b32.xlu0 %v3756_v23, %s3432_s30  ;;  %v3770_v31 = vmul.f32 0.35355338, %v3756_v23 }
 0x10c   : > { %v828_v24 = vpop.f32.mrf.mxu0 }
 0x10d   : > { %v3759_v25 = vadd.f32 %v3059_v21, %v828_v24 }
 0x10f   : > { %891 = vrot.lane.b32.xlu0 %v3759_v25, %s3432_s30  ;;  %v3776_v33 = vmul.f32 0.35355338, %v3759_v25 }
 0x114   : > { %v831_v26 = vpop.f32.mrf.mxu0 }
 0x115   : > { %v3762_v27 = vadd.f32 %v3059_v21, %v831_v26 }
 0x117   : > { %919 = vrot.lane.b32.xlu1 %v3762_v27, %s3432_s30  ;;  %v3782_v35 = vmul.f32 0.35355338, %v3762_v27  ;;  %v3034_v49 = vpack.i.bf16 %v3762_v27, %v3756_v23 }
 0x11c   : > { %v834_v28 = vpop.f32.mrf.mxu0 }
 0x11d   : > { %v3765_v29 = vadd.f32 %v3059_v21, %v834_v28 }
 0x11f   : > { %947 = vrot.lane.b32.xlu1 %v3765_v29, %s3432_s30  ;;  %v3788_v37 = vmul.f32 0.35355338, %v3765_v29  ;;  %v3039_v51 = vpack.i.bf16 %v3759_v25, %v3765_v29 }
 0x179   : > { %v863_v30 = vpop.permute.xlu0 %862 }
 0x17a   : > { %2842 = vmatpush.xpose.msk.msra.mxu1 %vm864_vm2, %v863_v30 }
 0x17d   : > { %2843 = vmatmul.msk.f32.vlgmr.msra.gmra.mxu1 %vm864_vm2, %v3770_v31 }
 0x181   : > { %v892_v32 = vpop.permute.xlu0 %891 }
 0x182   : > { %2844 = vmatpush.xpose.msk.msrb.mxu1 %vm864_vm2, %v892_v32 }
 0x185   : > { %2845 = vmatmul.msk.f32.vlgmr.msrb.gmra.mxu1 %vm864_vm2, %v3776_v33 }
 0x189   : > { %v920_v34 = vpop.permute.xlu1 %919 }
 0x18a   : > { %2846 = vmatpush.xpose.msk.msra.mxu3 %vm864_vm2, %v920_v34 }
 0x18d   : > { %2847 = vmatmul.msk.f32.vlgmr.msra.gmra.mxu3 %vm864_vm2, %v3782_v35 }
 0x191   : > { %v948_v36 = vpop.permute.xlu1 %947 }
 0x192   : > { %2848 = vmatpush.xpose.msk.msra.mxu1 %vm864_vm2, %v948_v36 }
 0x195   : > { %2849 = vmatmul.msk.f32.vlgmr.msra.gmra.mxu1 %vm864_vm2, %v3788_v37 }
 0x1fa   : > { %v887_v39 = vpop.f32.mrf.mxu1 }
 0x1fb   : > { %v888_v40 = vadd.f32 %v3792_v38, %v887_v39 }
 0x1fd   : > { %v974_v41 = vsel %vm864_vm2, %v888_v40, -inf }
 0x1fe   : > { %975 = vmax.xlane.f32.xlu2 %v974_v41 }
 0x202   : > { %v915_v43 = vpop.f32.mrf.mxu1 }
 0x203   : > { %v916_v44 = vadd.f32 %v3796_v42, %v915_v43 }
 0x205   : > { %v977_v45 = vsel %vm864_vm2, %v916_v44, -inf }
 0x206   : > { %978 = vmax.xlane.f32.xlu1 %v977_v45 }
 0x210   : > { %v943_v53 = vpop.f32.mrf.mxu3 }
 0x211   : > { %v944_v54 = vadd.f32 %v3816_v52, %v943_v53 }
 0x212   : > { %v971_v47 = vpop.f32.mrf.mxu1 }
 0x213   : > { %v972_v48 = vadd.f32 %v3800_v46, %v971_v47  ;;  %v980_v55 = vsel %vm864_vm2, %v944_v54, -inf }
 0x215   : > { %v983_v50 = vsel %vm864_vm2, %v972_v48, -inf }
 0x216   : > { %984 = vmax.xlane.f32.xlu0 %v983_v50  ;;  %3035 = vrot.lane.b32.xlu2 %v3034_v49, %s3433_s29 }
 0x21e   : > { %1152 = vrot.lane.b32.xlu2 %v3759_v25, %s3434_s0 }
 0x21f   : > { %3040 = vrot.lane.b32.xlu1 %v3039_v51, %s3433_s29 }
 0x227   : > { %1124 = vrot.lane.b32.xlu1 %v3756_v23, %s3434_s0 }
 0x22a   : > { %1180 = vrot.lane.b32.xlu0 %v3762_v27, %s3434_s0 }
 0x22f   : > { %1206 = vrot.lane.b32.xlu1 %v3788_v37, %s3435_s11 }
 0x247   : > { %981 = vmax.xlane.f32.xlu2 %v980_v55 }
 0x25f   : > { %1150 = vrot.lane.b32.xlu2 %v3776_v33, %s3435_s11 }
 0x267   : > { %1178 = vrot.lane.b32.xlu2 %v3782_v35, %s3435_s11 }
 0x271   : > { %v976_v56 = vpop.xlane.xlu2 %975 }
 0x272   : > { %v986_v63 = vsub.f32 %v888_v40, %v976_v56 }
 0x274   : > { %v990_v1 = vmul.f32 1.442695, %v986_v63 }
 0x279   : > { %v979_v57 = vpop.xlane.xlu1 %978  ;;  %v3036_v58 = vpop.permute.xlu2 %3035 }
 0x27a   : > { %v987_v59 = vsub.f32 %v916_v44, %v979_v57  ;;  %v3038_v60 = vunpack.i.h.bf16 %v3036_v58  ;;  %v3037_v61 = vunpack.i.l.bf16 %v3036_v58 }
 0x27c   : > { %v992_v62 = vmul.f32 1.442695, %v987_v59  ;;  %1039 = vmatpush.msra.mxu2 %v3037_v61  ;;  %1091 = vmatpush.msrb.mxu1 %v3038_v60 }
 0x27e   : > { %3071 = vpow2.f32 %v992_v62 }
 0x27f   : > { %3073 = vpow2.f32 %v990_v1 }
 0x281   : > { %v1153_v0 = vpop.permute.xlu2 %1152 }
 0x282   : > { %2856 = vmatpush.xpose.msk.msra.mxu1 %vm864_vm2, %v1153_v0 }
 0x284   : > { %v3072_v2 = vpop.eup %3071 }
 0x285   : > { %v1001_v3 = vsel %vm864_vm2, %v3072_v2, 0.0  ;;  %v3074_v4 = vpop.eup %3073 }
 0x286   : > { %1002 = vadd.xlane.f32.xlu0 %v1001_v3  ;;  %v998_v5 = vsel %vm864_vm2, %v3074_v4, 0.0 }
 0x289   : > { %v985_v10 = vpop.xlane.xlu0 %984 }
 0x28a   : > { %v989_v13 = vsub.f32 %v972_v48, %v985_v10 }
 0x28c   : > { %v996_v15 = vmul.f32 1.442695, %v989_v13 }
 0x290   : > { %999 = vadd.xlane.f32.xlu2 %v998_v5 }
 0x291   : > { %v3041_v6 = vpop.permute.xlu1 %3040 }
 0x292   : > { %v3043_v7 = vunpack.i.h.bf16 %v3041_v6  ;;  %v3042_v8 = vunpack.i.l.bf16 %v3041_v6 }
 0x294   : > { %1065 = vmatpush.msrb.mxu3 %v3043_v7  ;;  %1117 = vmatpush.msrb.mxu2 %v3042_v8 }
 0x299   : > { %v1125_v9 = vpop.permute.xlu1 %1124 }
 0x29a   : > { %1122 = vrot.lane.b32.xlu0 %v3770_v31, %s3435_s11  ;;  %2854 = vmatpush.xpose.msk.msra.mxu3 %vm864_vm2, %v1125_v9  ;;  %s4309_s11 = scalar_lea.vmem [#allocation12], %s3675_s26 }
 0x29c   : > { %v1181_v22 = vpop.permute.xlu0 %1180 }
 0x2a1   : > { %v1207_v50 = vpop.permute.xlu1 %1206 }
 0x2ba   : > { %v982_v11 = vpop.xlane.xlu2 %981 }
 0x2bb   : > { %v988_v12 = vsub.f32 %v944_v54, %v982_v11 }
 0x2bd   : > { %v994_v14 = vmul.f32 1.442695, %v988_v12 }
 0x2bf   : > { %3075 = vpow2.f32 %v994_v14 }
 0x2c0   : > { %3077 = vpow2.f32 %v996_v15 }
 0x2c2   : > { %v1151_v24 = vpop.permute.xlu2 %1150 }
 0x2c5   : > { %v3076_v16 = vpop.eup %3075 }
 0x2c6   : > { %v1004_v19 = vsel %vm864_vm2, %v3076_v16, 0.0  ;;  %v3078_v20 = vpop.eup %3077 }
 0x2c7   : > { %1005 = vadd.xlane.f32.xlu2 %v1004_v19  ;;  %v1007_v21 = vsel %vm864_vm2, %v3078_v20, 0.0 }
 0x2ca   : > { %v1179_v28 = vpop.permute.xlu2 %1178 }
 0x2cf   : > { %1008 = vadd.xlane.f32.xlu2 %v1007_v21 }
 0x2e7   : > { %1208 = vrot.lane.b32.xlu2 %v3765_v29, %s3434_s0 }
 0x2f9   : > { %v1003_v26 = vpop.xlane.xlu0 %1002 }
 0x2fa   : > { %3079 = vrcp.f32 %v1003_v26  ;;  %v3886_v26 = vld [vmem:[%s3706_s24 + $0x8] sm:$0xff] }
 0x300   : > { %v3080_v30 = vpop.eup %3079 }
 0x301   : > { %v1015_v32 = vmul.f32 %v3080_v30, %v3072_v2  ;;  %v3044_v2 = vpack.i.bf16 %v3762_v27, %v3759_v25 }
 0x303   : > { %2851 = vmatmul.msk.f32.vlgmr.msrb.gmra.mxu3 %vm864_vm2, %v1015_v32  ;;  %v1000_v34 = vpop.xlane.xlu2 %999 }
 0x304   : > { %3081 = vrcp.f32 %v1000_v34 }
 0x30a   : > { %v3082_v36 = vpop.eup %3081 }
 0x30b   : > { %v1014_v39 = vmul.f32 %v3082_v36, %v3074_v4 }
 0x30c   : > { %v1123_v40 = vpop.permute.xlu0 %1122 }
 0x30d   : > { %2850 = vmatmul.msk.f32.vlgmr.msra.gmra.mxu2 %vm864_vm2, %v1014_v39  ;;  %2855 = vmatmul.msk.f32.vlgmr.msra.gmra.mxu3 %vm864_vm2, %v1123_v40 }
 0x30e   : > { %2858 = vmatpush.xpose.msk.msra.mxu2 %vm864_vm2, %v1181_v22 }
 0x33a   : > { %v1006_v41 = vpop.xlane.xlu2 %1005 }
 0x33b   : > { %3083 = vrcp.f32 %v1006_v41 }
 0x341   : > { %v3084_v43 = vpop.eup %3083 }
 0x342   : > { %v1016_v44 = vmul.f32 %v3084_v43, %v3076_v16  ;;  %v1009_v45 = vpop.xlane.xlu2 %1008 }
 0x343   : > { %3085 = vrcp.f32 %v1009_v45 }
 0x344   : > { %2852 = vmatmul.msk.f32.vlgmr.msrb.gmra.mxu1 %vm864_vm2, %v1016_v44 }
 0x349   : > { %v3086_v47 = vpop.eup %3085 }
 0x34a   : > { %v1209_v48 = vpop.permute.xlu2 %1208  ;;  %v1017_v49 = vmul.f32 %v3086_v47, %v3078_v20 }
 0x34b   : > { %2860 = vmatpush.xpose.msk.msrb.mxu3 %vm864_vm2, %v1209_v48 }
 0x34c   : > { %2853 = vmatmul.msk.f32.vlgmr.msrb.gmra.mxu2 %vm864_vm2, %v1017_v49  ;;  %2857 = vmatmul.msk.f32.vlgmr.msra.gmra.mxu1 %vm864_vm2, %v1151_v24  ;;  %v857_v24 = vld [vmem:[%s3706_s24] sm:$0xff] }
 0x34e   : > { %2861 = vmatmul.msk.f32.vlgmr.msrb.gmra.mxu3 %vm864_vm2, %v1207_v50 }
 0x354   : > { %2859 = vmatmul.msk.f32.vlgmr.msra.gmra.mxu2 %vm864_vm2, %v1179_v28 }
 0x386   : > { %v3844_v51 = vpop.f32.mrf.mxu3 }
 0x390   : > { %v3848_v54 = vpop.f32.mrf.mxu2  ;;  %v3850_v55 = vpop.f32.mrf.mxu3 }
 0x3c1   : > { %v3846_v53 = vpop.f32.mrf.mxu1 }
 0x3c9   : > { %v1175_v56 = vpop.f32.mrf.mxu1 }
 0x3ca   : > { %v1176_v57 = vadd.f32 %v3796_v42, %v1175_v56 }
 0x3cc   : > { %v1237_v58 = vsel %vm864_vm2, %v1176_v57, -inf }
 0x3cd   : > { %1238 = vmax.xlane.f32.xlu0 %v1237_v58 }
 0x3cf   : > { %v3854_v59 = vpop.f32.mrf.mxu2 }
 0x3d1   : > { %v1231_v60 = vpop.f32.mrf.mxu3 }
 0x3d2   : > { %v1232_v61 = vadd.f32 %v3800_v46, %v1231_v60 }
 0x3d4   : > { %v1243_v62 = vsel %vm864_vm2, %v1232_v61, -inf }
 0x3d5   : > { %1244 = vmax.xlane.f32.xlu1 %v1243_v62 }
 0x3d7   : > { %v1203_v63 = vpop.f32.mrf.mxu2 }
 0x3d8   : > { %v1204_v0 = vadd.f32 %v3816_v52, %v1203_v63 }
 0x3da   : > { %v1240_v1 = vsel %vm864_vm2, %v1204_v0, -inf }
 0x3db   : > { %1241 = vmax.xlane.f32.xlu2 %v1240_v1 }
 0x3ee   : > { %3045 = vrot.lane.b32.xlu1 %v3044_v2, %s3436_s12 }
 0x3f6   : > { %1464 = vrot.lane.b32.xlu1 %v3770_v31, %s3437_s15 }
 0x3fe   : > { %1494 = vrot.lane.b32.xlu1 %v3759_v25, %s3438_s21 }
 0x406   : > { %1548 = vrot.lane.b32.xlu1 %v3788_v37, %s3437_s15 }
 0x440   : > { %v1239_v3 = vpop.xlane.xlu0 %1238 }
 0x441   : > { %v1247_v4 = vsub.f32 %v1176_v57, %v1239_v3 }
 0x443   : > { %v1252_v5 = vmul.f32 1.442695, %v1247_v4 }
 0x445   : > { %3087 = vpow2.f32 %v1252_v5 }
 0x448   : > { %v1245_v6 = vpop.xlane.xlu1 %1244 }
 0x449   : > { %v1249_v7 = vsub.f32 %v1232_v61, %v1245_v6 }
 0x44b   : > { %v3088_v8 = vpop.eup %3087  ;;  %v1256_v9 = vmul.f32 1.442695, %v1249_v7 }
 0x44c   : > { %v1261_v10 = vsel %vm864_vm2, %v3088_v8, 0.0 }
 0x44d   : > { %3089 = vpow2.f32 %v1256_v9  ;;  %1262 = vadd.xlane.f32.xlu0 %v1261_v10 }
 0x44e   : > { %v1242_v11 = vpop.xlane.xlu2 %1241 }
 0x44f   : > { %v1248_v12 = vsub.f32 %v1204_v0, %v1242_v11 }
 0x451   : > { %v1254_v13 = vmul.f32 1.442695, %v1248_v12 }
 0x453   : > { %v3090_v14 = vpop.eup %3089  ;;  %3091 = vpow2.f32 %v1254_v13 }
 0x454   : > { %v1267_v15 = vsel %vm864_vm2, %v3090_v14, 0.0 }
 0x455   : > { %1268 = vadd.xlane.f32.xlu0 %v1267_v15  ;;  %v3946_v15 = vadd.f32 %v3792_v38, %v3850_v55 }
 0x459   : > { %v3092_v16 = vpop.eup %3091 }
 0x45a   : > { %v1264_v19 = vsel %vm864_vm2, %v3092_v16, 0.0 }
 0x45b   : > { %1265 = vadd.xlane.f32.xlu2 %v1264_v19 }
 0x460   : > { %v3046_v20 = vpop.permute.xlu1 %3045 }
 0x461   : > { %v3048_v21 = vunpack.i.h.bf16 %v3046_v20  ;;  %v3047_v22 = vunpack.i.l.bf16 %v3046_v20 }
 0x463   : > { %1325 = vmatpush.msrb.mxu2 %v3047_v22  ;;  %1351 = vmatpush.msra.mxu3 %v3048_v21 }
 0x465   : > { %1450 = vmatpush.msra.mxu2 %v857_v24  ;;  %2927 = vmatpush.msrb.mxu3 %v3886_v26 }
 0x468   : > { %v1465_v36 = vpop.permute.xlu1 %1464 }
 0x469   : > { %1466 = vrot.lane.b32.xlu0 %v3756_v23, %s3438_s21 }
 0x470   : > { %v1495_v47 = vpop.permute.xlu1 %1494 }
 0x471   : > { %1520 = vrot.lane.b32.xlu0 %v3782_v35, %s3437_s15 }
 0x473   : > { %1356 = vrot.lane.b32.xlu2 %v3765_v29, %s3436_s12 }
 0x478   : > { %v1549_v57 = vpop.permute.xlu1 %1548 }
 0x479   : > { %1550 = vrot.lane.b32.xlu0 %v3765_v29, %s3438_s21 }
 0x47b   : > { %1522 = vrot.lane.b32.xlu2 %v3762_v27, %s3438_s21 }
 0x483   : > { %1492 = vrot.lane.b32.xlu2 %v3776_v33, %s3437_s15 }
 0x4c0   : > { %v1263_v28 = vpop.xlane.xlu0 %1262 }
 0x4c1   : > { %3093 = vrcp.f32 %v1263_v28 }
 0x4c7   : > { %v3094_v30 = vpop.eup %3093 }
 0x4c8   : > { %v1275_v32 = vmul.f32 %v3094_v30, %v3088_v8  ;;  %v1269_v34 = vpop.xlane.xlu0 %1268 }
 0x4c9   : > { %3095 = vrcp.f32 %v1269_v34 }
 0x4ca   : > { %2863 = vmatmul.msk.f32.vlgmr.msrb.gmra.mxu2 %vm864_vm2, %v1275_v32 }
 0x4ce   : > { %v1266_v39 = vpop.xlane.xlu2 %1265 }
 0x4cf   : > { %3097 = vrcp.f32 %v1266_v39  ;;  %v3096_v40 = vpop.eup %3095  ;;  %v3049_v39 = vpack.i.bf16 %v3759_v25, %v3756_v23 }
 0x4d0   : > { %v1277_v45 = vmul.f32 %v3096_v40, %v3090_v14 }
 0x4d2   : > { %2870 = vmatmul.msk.f32.vlgmr.msra.gmra.mxu2 %vm864_vm2, %v3848_v54 }
 0x4d5   : > { %v3098_v41 = vpop.eup %3097 }
 0x4d6   : > { %v1276_v43 = vmul.f32 %v3098_v41, %v3092_v16  ;;  %v1357_v44 = vpop.permute.xlu2 %1356 }
 0x4d7   : > { %1377 = vmatpush.msrb.mxu0 %v1357_v44 }
 0x4d8   : > { %2864 = vmatmul.msk.f32.vlgmr.msra.gmra.mxu3 %vm864_vm2, %v1276_v43  ;;  %2865 = vmatmul.msk.f32.vlgmr.msrb.gmra.mxu0 %vm864_vm2, %v1277_v45 }
 0x4d9   : > { %2876 = vmatpush.xpose.msk.msra.mxu0 %vm864_vm2, %v1495_v47 }
 0x4da   : > { %2871 = vmatmul.msk.f32.gmra.mxu2 %vm864_vm2, %v3844_v51 }
 0x4db   : > { %v1467_v48 = vpop.permute.xlu0 %1466 }
 0x4dc   : > { %2874 = vmatpush.xpose.msk.msra.mxu3 %vm864_vm2, %v1467_v48 }
 0x4de   : > { %v1523_v49 = vpop.permute.xlu2 %1522 }
 0x4e2   : > { %2872 = vmatmul.msk.f32.gmra.mxu2 %vm864_vm2, %v3846_v53 }
 0x4e3   : > { %v1521_v50 = vpop.permute.xlu0 %1520 }
 0x4e6   : > { %v1493_v54 = vpop.permute.xlu2 %1492 }
 0x4e7   : > { %2877 = vmatmul.msk.f32.vlgmr.msra.gmra.mxu0 %vm864_vm2, %v1493_v54 }
 0x4ea   : > { %2873 = vmatmul.msk.f32.gmra.mxu2 %vm864_vm2, %v3854_v59 }
 0x4eb   : > { %v1551_v56 = vpop.permute.xlu0 %1550 }
 0x4ec   : > { %2880 = vmatpush.xpose.msk.msrb.mxu0 %vm864_vm2, %v1551_v56 }
 0x4ef   : > { %2881 = vmatmul.msk.f32.vlgmr.msrb.gmra.mxu0 %vm864_vm2, %v1549_v57 }
 0x54d   : > { %v1327_v51 = vpop.f32.mrf.mxu2 }
 0x54e   : > { %2867 = vmatmul.msk.f32.vlgmr.msrb.gmra.mxu3 %vm864_vm2, %v1327_v51 }
 0x54f   : > { %2878 = vmatpush.xpose.msk.msrb.mxu3 %vm864_vm2, %v1523_v49 }
 0x555   : > { %v1379_v53 = vpop.f32.mrf.mxu0  ;;  %v3963_v57 = vpop.f32.mrf.mxu2 }
 0x55b   : > { %v1353_v58 = vpop.f32.mrf.mxu3 }
 0x55c   : > { %2868 = vmatmul.msk.f32.gmra.mxu3 %vm864_vm2, %v1353_v58 }
 0x564   : > { %2869 = vmatmul.msk.f32.gmra.mxu3 %vm864_vm2, %v1379_v53  ;;  %v1517_v60 = vpop.f32.mrf.mxu0 }
 0x565   : > { %v1518_v59 = vadd.f32 %v3796_v42, %v1517_v60 }
 0x567   : > { %v1579_v61 = vsel %vm864_vm2, %v1518_v59, -inf }
 0x568   : > { %1580 = vmax.xlane.f32.xlu0 %v1579_v61 }
 0x56c   : > { %2875 = vmatmul.msk.f32.vlgmr.msra.gmra.mxu3 %vm864_vm2, %v1465_v36  ;;  %v1573_v62 = vpop.f32.mrf.mxu0 }
 0x56d   : > { %v3913_v63 = vadd.f32 %v3800_v46, %v1573_v62 }
 0x56f   : > { %v1585_v0 = vsel %vm864_vm2, %v3913_v63, -inf }
 0x570   : > { %1586 = vmax.xlane.f32.xlu2 %v1585_v0 }
 0x574   : > { %2879 = vmatmul.msk.f32.vlgmr.msrb.gmra.mxu3 %vm864_vm2, %v1521_v50 }
 0x5d1   : > { %v3918_v1 = vpop.f32.mrf.mxu3 }
 0x5db   : > { %v1581_v4 = vpop.xlane.xlu0 %1580 }
 0x5dc   : > { %v1589_v7 = vsub.f32 %v1518_v59, %v1581_v4  ;;  %v3967_v59 = vpop.f32.mrf.mxu2 }
 0x5de   : > { %v1594_v9 = vmul.f32 1.442695, %v1589_v7 }
 0x5df   : > { %v3920_v2 = vpop.f32.mrf.mxu3 }
 0x5e0   : > { %3099 = vpow2.f32 %v1594_v9 }
 0x5e6   : > { %v3928_v13 = vpop.eup %3099 }
 0x5e7   : > { %v3922_v3 = vpop.f32.mrf.mxu3  ;;  %v1603_v14 = vsel %vm864_vm2, %v3928_v13, 0.0 }
 0x5ef   : > { %v1489_v5 = vpop.f32.mrf.mxu3 }
 0x5f0   : > { %v1490_v6 = vadd.f32 %v3792_v38, %v1489_v5  ;;  %v3974_v5 = vpop.f32.mrf.mxu2 }
 0x5f2   : > { %v1576_v8 = vsel %vm864_vm2, %v1490_v6, -inf }
 0x5f3   : > { %1577 = vmax.xlane.f32.xlu2 %v1576_v8 }
 0x5f7   : > { %v1545_v10 = vpop.f32.mrf.mxu3 }
 0x5f8   : > { %v1546_v11 = vadd.f32 %v3816_v52, %v1545_v10  ;;  %v3977_v7 = vpop.f32.mrf.mxu2 }
 0x5fa   : > { %v1582_v12 = vsel %vm864_vm2, %v1546_v11, -inf }
 0x5fb   : > { %1583 = vmax.xlane.f32.xlu1 %v1582_v12 }
 0x603   : > { %1604 = vadd.xlane.f32.xlu1 %v1603_v14 }
 0x60b   : > { %1769 = vrot.lane.b32.xlu2 %v3770_v31, %s3439_s28  ;;  %v1587_v31 = vpop.xlane.xlu2 %1586 }
 0x60c   : > { %v1591_v44 = vsub.f32 %v3913_v63, %v1587_v31 }
 0x60e   : > { %v1598_v45 = vmul.f32 1.442695, %v1591_v44 }
 0x613   : > { %1799 = vrot.lane.b32.xlu2 %v3759_v25, %s3440_s25 }
 0x61b   : > { %1797 = vrot.lane.b32.xlu2 %v3776_v33, %s3439_s28  ;;  %v1234_v33 = vsel %vm864_vm2, %v3946_v15, -inf }
 0x61c   : > { %1771 = vrot.lane.b32.xlu1 %v3756_v23, %s3440_s25 }
 0x623   : > { %1855 = vrot.lane.b32.xlu2 %v3765_v29, %s3440_s25 }
 0x624   : > { %1672 = vrot.lane.b32.xlu1 %v3762_v27, %s3441_s10 }
 0x62c   : > { %1698 = vrot.lane.b32.xlu1 %v3765_v29, %s3441_s10 }
 0x634   : > { %1827 = vrot.lane.b32.xlu1 %v3762_v27, %s3440_s25 }
 0x63c   : > { %1825 = vrot.lane.b32.xlu1 %v3782_v35, %s3439_s28 }
 0x666   : > { %v1578_v16 = vpop.xlane.xlu2 %1577  ;;  %1235 = vmax.xlane.f32.xlu1 %v1234_v33 }
 0x667   : > { %v1588_v19 = vsub.f32 %v1490_v6, %v1578_v16 }
 0x669   : > { %v1592_v20 = vmul.f32 1.442695, %v1588_v19 }
 0x66b   : > { %3101 = vpow2.f32 %v1592_v20 }
 0x66e   : > { %v1584_v21 = vpop.xlane.xlu1 %1583  ;;  %v1770_v30 = vpop.permute.xlu2 %1769 }
 0x66f   : > { %v1590_v22 = vsub.f32 %v1546_v11, %v1584_v21 }
 0x671   : > { %v3102_v24 = vpop.eup %3101  ;;  %v1596_v28 = vmul.f32 1.442695, %v1590_v22 }
 0x672   : > { %v1600_v35 = vsel %vm864_vm2, %v3102_v24, 0.0 }
 0x673   : > { %3103 = vpow2.f32 %v1596_v28  ;;  %1601 = vadd.xlane.f32.xlu0 %v1600_v35 }
 0x674   : > { %3105 = vpow2.f32 %v1598_v45 }
 0x676   : > { %v1800_v34 = vpop.permute.xlu2 %1799  ;;  %v1605_v40 = vpop.xlane.xlu1 %1604 }
 0x677   : > { %3107 = vrcp.f32 %v1605_v40 }
 0x679   : > { %v3104_v32 = vpop.eup %3103 }
 0x67a   : > { %v1606_v55 = vsel %vm864_vm2, %v3104_v32, 0.0  ;;  %v3106_v47 = vpop.eup %3105 }
 0x67b   : > { %1607 = vadd.xlane.f32.xlu2 %v1606_v55 }
 0x67d   : > { %v3108_v53 = vpop.eup %3107 }
 0x67e   : > { %v1798_v36 = vpop.permute.xlu2 %1797  ;;  %v1617_v0 = vmul.f32 %v3108_v53, %v3928_v13 }
 0x67f   : > { %1278 = vrot.lane.b32.xlu1 %v3756_v23, %s3436_s12  ;;  %v1609_v23 = vsel %vm864_vm2, %v3106_v47, 0.0 }
 0x686   : > { %v1856_v43 = vpop.permute.xlu2 %1855 }
 0x687   : > { %3050 = vrot.lane.b32.xlu0 %v3049_v39, %s3441_s10 }
 0x68e   : > { %v1772_v41 = vpop.permute.xlu1 %1771 }
 0x68f   : > { %2890 = vmatpush.xpose.msk.msrb.mxu2 %vm864_vm2, %v1772_v41 }
 0x692   : > { %2891 = vmatmul.msk.f32.vlgmr.msrb.gmra.mxu2 %vm864_vm2, %v1770_v30 }
 0x693   : > { %2896 = vmatpush.xpose.msk.msra.mxu2 %vm864_vm2, %v1856_v43  ;;  %1853 = vrot.lane.b32.xlu2 %v3788_v37, %s3439_s28 }
 0x696   : > { %v1673_v25 = vpop.permute.xlu1 %1672 }
 0x69e   : > { %v1699_v48 = vpop.permute.xlu1 %1698 }
 0x6a6   : > { %v1828_v49 = vpop.permute.xlu1 %1827 }
 0x6ae   : > { %v1826_v50 = vpop.permute.xlu1 %1825 }
 0x6b1   : > { %1610 = vadd.xlane.f32.xlu0 %v1609_v23 }
 0x6d9   : > { %v1236_v54 = vpop.xlane.xlu1 %1235 }
 0x6da   : > { %v1246_v14 = vsub.f32 %v3946_v15, %v1236_v54 }
 0x6e6   : > { %v1602_v51 = vpop.xlane.xlu0 %1601 }
 0x6e7   : > { %3109 = vrcp.f32 %v1602_v51 }
 0x6ed   : > { %v3110_v60 = vpop.eup %3109 }
 0x6ee   : > { %v1608_v56 = vpop.xlane.xlu2 %1607  ;;  %v1616_v4 = vmul.f32 %v3110_v60, %v3102_v24 }
 0x6ef   : > { %3111 = vrcp.f32 %v1608_v56 }
 0x6f1   : > { %v1279_v58 = vpop.permute.xlu1 %1278 }
 0x6f2   : > { %1299 = vmatpush.msrb.mxu1 %v1279_v58 }
 0x6f4   : > { %1409 = vmatpush.msra.mxu1 %v3886_v26 }
 0x6f5   : > { %v3112_v26 = vpop.eup %3111 }
 0x6f6   : > { %v1854_v37 = vpop.permute.xlu2 %1853  ;;  %v1618_v6 = vmul.f32 %v3112_v26, %v3104_v32 }
 0x6f7   : > { %2897 = vmatmul.msk.f32.vlgmr.msra.gmra.mxu2 %vm864_vm2, %v1854_v37 }
 0x6f9   : > { %v3051_v61 = vpop.permute.xlu0 %3050 }
 0x6fa   : > { %v3053_v62 = vunpack.i.h.bf16 %v3051_v61  ;;  %v3052_v63 = vunpack.i.l.bf16 %v3051_v61 }
 0x6fc   : > { %1641 = vmatpush.msra.mxu3 %v3052_v63  ;;  %1667 = vmatpush.msra.mxu0 %v3053_v62 }
 0x6fd   : > { %2882 = vmatmul.msk.f32.vlgmr.msra.gmra.mxu3 %vm864_vm2, %v1616_v4  ;;  %2883 = vmatmul.msk.f32.vlgmr.msra.gmra.mxu0 %vm864_vm2, %v1617_v0 }
 0x6fe   : > { %1693 = vmatpush.msrb.mxu3 %v1673_v25  ;;  %1719 = vmatpush.msrb.mxu0 %v1699_v48 }
 0x700   : > { %2892 = vmatpush.xpose.msk.msra.mxu3 %vm864_vm2, %v1800_v34  ;;  %2894 = vmatpush.xpose.msk.msra.mxu0 %vm864_vm2, %v1828_v49 }
 0x705   : > { %2884 = vmatmul.msk.f32.vlgmr.msrb.gmra.mxu3 %vm864_vm2, %v1618_v6  ;;  %v859_v6 = vld [vmem:[%s3706_s24 + $0x10] sm:$0xff] }
 0x70d   : > { %2893 = vmatmul.msk.f32.vlgmr.msra.gmra.mxu3 %vm864_vm2, %v1798_v36 }
 0x715   : > { %v1794_v8 = vpop.f32.mrf.mxu2 }
 0x716   : > { %v1795_v9 = vadd.f32 %v3792_v38, %v1794_v8  ;;  %v1250_v38 = vmul.f32 1.442695, %v1246_v14 }
 0x718   : > { %v1881_v10 = vsel %vm864_vm2, %v1795_v9, -inf }
 0x719   : > { %1882 = vmax.xlane.f32.xlu2 %v1881_v10 }
 0x724   : > { %v1611_v11 = vpop.xlane.xlu0 %1610 }
 0x725   : > { %3113 = vrcp.f32 %v1611_v11 }
 0x726   : > { %3115 = vpow2.f32 %v1250_v38 }
 0x72b   : > { %v3114_v12 = vpop.eup %3113 }
 0x72c   : > { %v1619_v13 = vmul.f32 %v3114_v12, %v3106_v47  ;;  %v3116_v19 = vpop.eup %3115 }
 0x72d   : > { %v1258_v20 = vsel %vm864_vm2, %v3116_v19, 0.0 }
 0x72e   : > { %2885 = vmatmul.msk.f32.vlgmr.msrb.gmra.mxu0 %vm864_vm2, %v1619_v13 }
 0x731   : > { %3055 = vrot.lane.b32.xlu2 %v3049_v39, %s3442_s13 }
 0x736   : > { %2895 = vmatmul.msk.f32.vlgmr.msra.gmra.mxu0 %vm864_vm2, %v1826_v50 }
 0x739   : > { %1977 = vrot.lane.b32.xlu2 %v3762_v27, %s3442_s13 }
 0x77a   : > { %v1878_v31 = vpop.f32.mrf.mxu2  ;;  %v1669_v15 = vpop.f32.mrf.mxu0 }
 0x77b   : > { %v1879_v33 = vadd.f32 %v3800_v46, %v1878_v31 }
 0x77d   : > { %v1890_v16 = vsel %vm864_vm2, %v1879_v33, -inf }
 0x77e   : > { %1891 = vmax.xlane.f32.xlu0 %v1890_v16 }
 0x780   : > { %v1643_v30 = vpop.f32.mrf.mxu3 }
 0x786   : > { %1259 = vadd.xlane.f32.xlu0 %v1258_v20 }
 0x788   : > { %v1695_v46 = vpop.f32.mrf.mxu3 }
 0x78c   : > { %v1883_v21 = vpop.xlane.xlu2 %1882 }
 0x78d   : > { %v1893_v34 = vsub.f32 %v1795_v9, %v1883_v21  ;;  %v860_v9 = vld [vmem:[%s3706_s24 + $0x18] sm:$0xff] }
 0x78f   : > { %v1897_v40 = vmul.f32 1.442695, %v1893_v34 }
 0x790   : > { %v1822_v39 = vpop.f32.mrf.mxu3 }
 0x791   : > { %v1823_v41 = vadd.f32 %v3796_v42, %v1822_v39  ;;  %3117 = vpow2.f32 %v1897_v40 }
 0x793   : > { %v1884_v43 = vsel %vm864_vm2, %v1823_v41, -inf }
 0x794   : > { %v3056_v22 = vpop.permute.xlu2 %3055 }
 0x795   : > { %v3058_v24 = vunpack.i.h.bf16 %v3056_v22  ;;  %v3057_v28 = vunpack.i.l.bf16 %v3056_v22 }
 0x797   : > { %1946 = vmatpush.msrb.mxu3 %v3057_v28  ;;  %1972 = vmatpush.msrb.mxu0 %v3058_v24  ;;  %v3118_v44 = vpop.eup %3117 }
 0x798   : > { %v1905_v45 = vsel %vm864_vm2, %v3118_v44, 0.0 }
 0x799   : > { %2056 = vmatpush.msra.mxu0 %v860_v9 }
 0x79c   : > { %v1978_v27 = vpop.permute.xlu2 %1977 }
 0x79d   : > { %1998 = vmatpush.msrb.mxu2 %v1978_v27  ;;  %v3064_v27 = vld [vmem:[%s4303_s16] ss:$0 sm:$0xff] }
 0x7ab   : > { %v1721_v35 = vpop.f32.mrf.mxu0 }
 0x7b3   : > { %v1850_v32 = vpop.f32.mrf.mxu0 }
 0x7b4   : > { %v1851_v55 = vadd.f32 %v3816_v52, %v1850_v32 }
 0x7b6   : > { %v1887_v36 = vsel %vm864_vm2, %v1851_v55, -inf }
 0x7b7   : > { %1888 = vmax.xlane.f32.xlu0 %v1887_v36 }
 0x7bf   : > { %1885 = vmax.xlane.f32.xlu0 %v1884_v43 }
 0x7c7   : > { %1906 = vadd.xlane.f32.xlu0 %v1905_v45 }
 0x7f1   : > { %v1892_v47 = vpop.xlane.xlu0 %1891 }
 0x7f2   : > { %v1896_v50 = vsub.f32 %v1879_v33, %v1892_v47 }
 0x7f4   : > { %v1903_v42 = vmul.f32 1.442695, %v1896_v50 }
 0x7f9   : > { %v1260_v23 = vpop.xlane.xlu0 %1259 }
 0x7fa   : > { %3119 = vrcp.f32 %v1260_v23 }
 0x800   : > { %v3120_v52 = vpop.eup %3119 }
 0x801   : > { %v1274_v25 = vmul.f32 %v3120_v52, %v3116_v19 }
 0x803   : > { %2862 = vmatmul.msk.f32.vlgmr.msrb.gmra.mxu1 %vm864_vm2, %v1274_v25 }
 0x804   : > { %1751 = vmatpush.msrb.mxu1 %v859_v6  ;;  %v3164_v6 = vld [vmem:[#allocation2 + $0x18] sm:$0xff] }
 0x82a   : > { %v1889_v48 = vpop.xlane.xlu0 %1888 }
 0x82b   : > { %v1895_v49 = vsub.f32 %v1851_v55, %v1889_v48 }
 0x82d   : > { %v1901_v54 = vmul.f32 1.442695, %v1895_v49  ;;  %v1459_v49 = vadd.f32 %v3974_v5, %v3920_v2  ;;  %v3163_v2 = vld [vmem:[#allocation2 + $0x10] sm:$0xff] }
 0x82f   : > { %3121 = vpow2.f32 %v1901_v54 }
 0x830   : > { %3123 = vpow2.f32 %v1903_v42 }
 0x832   : > { %v1886_v56 = vpop.xlane.xlu0 %1885 }
 0x833   : > { %v1894_v58 = vsub.f32 %v1823_v41, %v1886_v56 }
 0x835   : > { %v3122_v51 = vpop.eup %3121  ;;  %v1899_v53 = vmul.f32 1.442695, %v1894_v58 }
 0x836   : > { %v1911_v37 = vsel %vm864_vm2, %v3122_v51, 0.0  ;;  %v3124_v61 = vpop.eup %3123 }
 0x837   : > { %1912 = vadd.xlane.f32.xlu0 %v1911_v37  ;;  %v1914_v62 = vsel %vm864_vm2, %v3124_v61, 0.0 }
 0x83a   : > { %v1907_v60 = vpop.xlane.xlu0 %1906 }
 0x83b   : > { %3125 = vrcp.f32 %v1907_v60 }
 0x83c   : > { %3127 = vpow2.f32 %v1899_v53 }
 0x83f   : > { %1915 = vadd.xlane.f32.xlu0 %v1914_v62 }
 0x841   : > { %v3126_v63 = vpop.eup %3125 }
 0x842   : > { %v1921_v0 = vmul.f32 %v3126_v63, %v3118_v44  ;;  %v3128_v4 = vpop.eup %3127  ;;  %v1456_v44 = vadd.f32 %v3967_v59, %v3918_v1 }
 0x843   : > { %v1908_v26 = vsel %vm864_vm2, %v3128_v4, 0.0 }
 0x844   : > { %2898 = vmatmul.msk.f32.vlgmr.msrb.gmra.mxu3 %vm864_vm2, %v1921_v0 }
 0x847   : > { %1909 = vadd.xlane.f32.xlu0 %v1908_v26 }
 0x85b   : > { %2003 = vrot.lane.b32.xlu0 %v3765_v29, %s3442_s13 }
 0x880   : > { %v1301_v8 = vpop.f32.mrf.mxu1 }
 0x881   : > { %2866 = vmatmul.msk.f32.vlgmr.msra.gmra.mxu1 %vm864_vm2, %v1301_v8 }
 0x889   : > { %2886 = vmatmul.msk.f32.vlgmr.msrb.gmra.mxu1 %vm864_vm2, %v1643_v30 }
 0x891   : > { %2887 = vmatmul.msk.f32.gmra.mxu1 %vm864_vm2, %v1669_v15 }
 0x899   : > { %2888 = vmatmul.msk.f32.gmra.mxu1 %vm864_vm2, %v1695_v46 }
 0x8a1   : > { %2889 = vmatmul.msk.f32.gmra.mxu1 %vm864_vm2, %v1721_v35 }
 0x8aa   : > { %v1913_v10 = vpop.xlane.xlu0 %1912 }
 0x8ab   : > { %3129 = vrcp.f32 %v1913_v10  ;;  %v2200_v10 = vld [vmem:[%s3715_s27 + $0x18] sm:$0xff] }
 0x8ac   : > { %2229 = vmatpush.msra.mxu2 %v2200_v10 }
 0x8b1   : > { %v3130_v11 = vpop.eup %3129 }
 0x8b2   : > { %v1923_v12 = vmul.f32 %v3130_v11, %v3122_v51  ;;  %v1916_v29 = vpop.xlane.xlu0 %1915 }
 0x8b4   : > { %2900 = vmatmul.msk.f32.vlgmr.msrb.gmra.mxu2 %vm864_vm2, %v1923_v12  ;;  %v2198_v12 = vld [vmem:[%s3715_s27 + $0x8] sm:$0xff] }
 0x8ba   : > { %v1910_v13 = vpop.xlane.xlu0 %1909 }
 0x8bb   : > { %3131 = vrcp.f32 %v1910_v13 }
 0x8bc   : > { %3133 = vrcp.f32 %v1916_v29  ;;  %v2197_v29 = vld [vmem:[%s3715_s27] sm:$0xff] }
 0x8c1   : > { %v3132_v14 = vpop.eup %3131 }
 0x8c2   : > { %v1922_v38 = vmul.f32 %v3132_v14, %v3128_v4  ;;  %v3134_v31 = vpop.eup %3133 }
 0x8c3   : > { %v1924_v16 = vmul.f32 %v3134_v31, %v3124_v61 }
 0x8c4   : > { %2899 = vmatmul.msk.f32.vlgmr.msrb.gmra.mxu0 %vm864_vm2, %v1922_v38 }
 0x8c7   : > { %v1948_v33 = vpop.f32.mrf.mxu3 }
 0x8cc   : > { %2902 = vmatmul.msk.f32.vlgmr.msra.gmra.mxu0 %vm864_vm2, %v1948_v33 }
 0x8cd   : > { %v2004_v19 = vpop.permute.xlu0 %2003 }
 0x8ce   : > { %2024 = vmatpush.msra.mxu3 %v2004_v19 }
 0x8cf   : > { %2901 = vmatmul.msk.f32.vlgmr.msra.gmra.mxu3 %vm864_vm2, %v1924_v16 }
 0x8fe   : > { %v1411_v20 = vpop.f32.mrf.mxu1 }
 0x8ff   : > { %v1453_v24 = vadd.f32 %v3963_v57, %v1411_v20  ;;  %v3443_v57 = vmov 32.0  }
 0x900   : > { %3135 = vrcp.f32 %v3443_v57 }
 0x906   : > { %v1753_v22 = vpop.f32.mrf.mxu1  ;;  %v3136_v36 = vpop.eup %3135 }
 0x907   : > { %v1765_v28 = vadd.f32 %v1753_v22, %v1453_v24  ;;  %v2101_v39 = vmul.f32 32.0, %v3136_v36  ;;  %vm2105_vm3 = vweird.f32 %v3136_v36 }
 0x909   : > { %v2102_v40 = vsub.f32 1.0, %v2101_v39 }
 0x90b   : > { %v2103_v43 = vmul.f32 %v3136_v36, %v2102_v40 }
 0x90d   : > { %v2104_v47 = vadd.f32 %v3136_v36, %v2103_v43  ;;  %v4073_v43 = vld [vmem:[%s4305_s9] ss:$0 sm:$0xff] }
 0x90e   : > { %v1756_v41 = vpop.f32.mrf.mxu1 }
 0x90f   : > { %v1766_v45 = vadd.f32 %v1756_v41, %v1456_v44  ;;  %v4027_v48 = vsel %vm2105_vm3, %v3136_v36, %v2104_v47 }
 0x916   : > { %v1759_v52 = vpop.f32.mrf.mxu1 }
 0x917   : > { %v1767_v56 = vadd.f32 %v1759_v52, %v1459_v49 }
 0x91e   : > { %v1762_v60 = vpop.f32.mrf.mxu1 }
 0x937   : > { %v2000_v15 = vpop.f32.mrf.mxu2 }
 0x941   : > { %v1974_v21 = vpop.f32.mrf.mxu0 }
 0x942   : > { %2903 = vmatmul.msk.f32.gmra.mxu0 %vm864_vm2, %v1974_v21 }
 0x949   : > { %v2058_v30 = vpop.f32.mrf.mxu0 }
 0x94a   : > { %v2070_v35 = vadd.f32 %v2058_v30, %v1765_v28  ;;  %2904 = vmatmul.msk.f32.gmra.mxu0 %vm864_vm2, %v2000_v15 }
 0x94c   : > { %v2078_v46 = vadd.f32 %v3064_v27, %v2070_v35 }
 0x94e   : > { %v2082_v32 = vadd.f32 %v2078_v46, %v3741_v17 }
 0x950   : > { %v2088_v55 = vsel %vm795_vm1, %v2082_v32, 0.0 }
 0x951   : > { %2089 = vadd.xlane.f32.xlu1 %v2088_v55 }
 0x952   : > { %v2026_v34 = vpop.f32.mrf.mxu3 }
 0x953   : > { %2905 = vmatmul.msk.f32.gmra.mxu0 %vm864_vm2, %v2026_v34 }
 0x9bf   : > { %v2061_v23 = vpop.f32.mrf.mxu0 }
 0x9c0   : > { %v2071_v17 = vadd.f32 %v2061_v23, %v1766_v45 }
 0x9c2   : > { %v2079_v25 = vadd.f32 %v3064_v27, %v2071_v17 }
 0x9c4   : > { %v2090_v50 = vpop.xlane.xlu1 %2089  ;;  %v2083_v54 = vadd.f32 %v2079_v25, %v3745_v18  ;;  %v1462_v18 = vadd.f32 %v3977_v7, %v3922_v3  ;;  %v2199_v7 = vld [vmem:[%s3715_s27 + $0x10] sm:$0xff]  ;;  %s4304_s27 = scalar_lea.vmem [#allocation9], %s3675_s26 }
 0x9c5   : > { %v2107_v42 = vmul.f32 %v4027_v48, %v2090_v50  ;;  %2230 = vmatpush.msra.mxu2 %v2199_v7  ;;  %v4068_v39 = vld [vmem:[%s4304_s27] ss:$0 sm:$0xff] }
 0x9c6   : > { %v2091_v1 = vsel %vm795_vm1, %v2083_v54, 0.0  ;;  %v1768_v63 = vadd.f32 %v1762_v60, %v1462_v18 }
 0x9c7   : > { %v4034_v59 = vsub.f32 %v2082_v32, %v2107_v42  ;;  %2092 = vadd.xlane.f32.xlu2 %v2091_v1  ;;  %v2064_v51 = vpop.f32.mrf.mxu0  ;;  %2231 = vmatpush.msra.mxu2 %v2198_v12 }
 0x9c8   : > { %v2072_v58 = vadd.f32 %v2064_v51, %v1767_v56 }
 0x9c9   : > { %v2115_v53 = vmul.f32 %v4034_v59, %v4034_v59  ;;  %2232 = vmatpush.msra.mxu2 %v2197_v29 }
 0x9ca   : > { %v2080_v37 = vadd.f32 %v3064_v27, %v2072_v58 }
 0x9cb   : > { %v2119_v61 = vsel %vm795_vm1, %v2115_v53, 0.0 }
 0x9cc   : > { %v2084_v5 = vadd.f32 %v3163_v2, %v2080_v37  ;;  %v3444_v37 = vmov 1.4142135  }
 0x9ce   : > { %v2094_v62 = vsel %vm795_vm1, %v2084_v5, 0.0 }
 0x9cf   : > { %2120 = vadd.xlane.f32.xlu2 %v2119_v61  ;;  %2095 = vadd.xlane.f32.xlu0 %v2094_v62 }
 0x9d0   : > { %v2067_v0 = vpop.f32.mrf.mxu0 }
 0x9d1   : > { %v2073_v4 = vadd.f32 %v2067_v0, %v1768_v63 }
 0x9d3   : > { %v2081_v26 = vadd.f32 %v3064_v27, %v2073_v4 }
 0x9d5   : > { %v2085_v8 = vadd.f32 %v3164_v6, %v2081_v26 }
 0x9d7   : > { %v2097_v9 = vsel %vm795_vm1, %v2085_v8, 0.0 }
 0x9d8   : > { %2098 = vadd.xlane.f32.xlu1 %v2097_v9 }
 0xa3a   : > { %v2093_v3 = vpop.xlane.xlu2 %2092 }
 0xa3b   : > { %v2108_v11 = vmul.f32 %v4027_v48, %v2093_v3 }
 0xa3d   : > { %v4048_v13 = vsub.f32 %v2083_v54, %v2108_v11 }
 0xa3f   : > { %v2116_v14 = vmul.f32 %v4048_v13, %v4048_v13 }
 0xa41   : > { %v2122_v38 = vsel %vm795_vm1, %v2116_v14, 0.0 }
 0xa42   : > { %v2121_v31 = vpop.xlane.xlu2 %2120  ;;  %v2096_v33 = vpop.xlane.xlu0 %2095  ;;  %2123 = vadd.xlane.f32.xlu1 %v2122_v38 }
 0xa43   : > { %v2131_v16 = vmul.f32 %v2121_v31, %v4027_v48  ;;  %v2109_v19 = vmul.f32 %v4027_v48, %v2096_v33 }
 0xa45   : > { %v2135_v20 = vadd.f32 1e-05, %v2131_v16  ;;  %v4055_v21 = vsub.f32 %v2084_v5, %v2109_v19 }
 0xa47   : > { %3137 = vrsqrt.f32 %v2135_v20  ;;  %v2117_v22 = vmul.f32 %v4055_v21, %v4055_v21  ;;  %vm2145_vm5 = vweird.f32 %v2135_v20 }
 0xa49   : > { %v2125_v24 = vsel %vm795_vm1, %v2117_v22, 0.0 }
 0xa4a   : > { %2126 = vadd.xlane.f32.xlu2 %v2125_v24 }
 0xa4b   : > { %v2099_v28 = vpop.xlane.xlu1 %2098 }
 0xa4c   : > { %v2110_v27 = vmul.f32 %v4027_v48, %v2099_v28 }
 0xa4d   : > { %v3138_v15 = vpop.eup %3137 }
 0xa4e   : > { %v2140_v30 = vmul.f32 %v3138_v15, %v2135_v20  ;;  %v4061_v35 = vsub.f32 %v2085_v8, %v2110_v27  ;;  %vm2146_vm4 = vweird.f32 %v3138_v15 }
 0xa4f   : > { %vm2147_vm6 = vmor %vm2145_vm5, %vm2146_vm4 }
 0xa50   : > { %v2141_v46 = vmul.f32 %v3138_v15, %v2140_v30  ;;  %v2118_v32 = vmul.f32 %v4061_v35, %v4061_v35 }
 0xa52   : > { %v2142_v55 = vmul.f32 0.5, %v2141_v46  ;;  %v2128_v34 = vsel %vm795_vm1, %v2118_v32, 0.0  ;;  %v2436_v32 = vld [vmem:[%s3725_s2 + $0x38] sm:$0xff] }
 0xa53   : > { %2129 = vadd.xlane.f32.xlu1 %v2128_v34  ;;  %2462 = vmatpush.msra.mxu1 %v2436_v32 }
 0xa54   : > { %v2143_v57 = vsub.f32 1.5, %v2142_v55 }
 0xa56   : > { %v2144_v36 = vmul.f32 %v3138_v15, %v2143_v57  ;;  %v2435_v57 = vld [vmem:[%s3725_s2 + $0x30] sm:$0xff] }
 0xa57   : > { %2463 = vmatpush.msra.mxu1 %v2435_v57 }
 0xa58   : > { %v2148_v40 = vsel %vm2147_vm6, %v3138_v15, %v2144_v36  ;;  %vm2441_vm6 = vcmask 523264  }
 0xa59   : > { %v2179_v41 = vmul.f32 %v2148_v40, %v4034_v59  ;;  %v2434_v40 = vld [vmem:[%s3725_s2 + $0x28] sm:$0xff] }
 0xa5a   : > { %2464 = vmatpush.msra.mxu1 %v2434_v40 }
 0xa5b   : > { %v2186_v44 = vmul.f32 %v4068_v39, %v2179_v41 }
 0xa5d   : > { %v4077_v45 = vadd.f32 %v4073_v43, %v2186_v44  ;;  %v2433_v44 = vld [vmem:[%s3725_s2 + $0x20] sm:$0xff] }
 0xa5e   : > { %2465 = vmatpush.msra.mxu1 %v2433_v44 }
 0xa5f   : > { %2906 = vmatmul.msk.f32.vlgmr.msra.gmra.mxu2 %vm795_vm1, %v4077_v45 }
 0xab5   : > { %v2124_v47 = vpop.xlane.xlu1 %2123 }
 0xab6   : > { %v2132_v23 = vmul.f32 %v2124_v47, %v4027_v48 }
 0xab8   : > { %v2136_v17 = vadd.f32 1e-05, %v2132_v23  ;;  %v2432_v23 = vld [vmem:[%s3725_s2 + $0x18] sm:$0xff] }
 0xab9   : > { %2466 = vmatpush.msra.mxu1 %v2432_v23 }
 0xaba   : > { %3139 = vrsqrt.f32 %v2136_v17  ;;  %vm2155_vm8 = vweird.f32 %v2136_v17 }
 0xabd   : > { %v2127_v52 = vpop.xlane.xlu2 %2126 }
 0xabe   : > { %v2133_v25 = vmul.f32 %v2127_v52, %v4027_v48 }
 0xac0   : > { %v3140_v49 = vpop.eup %3139  ;;  %v2137_v50 = vadd.f32 1e-05, %v2133_v25  ;;  %v2431_v25 = vld [vmem:[%s3725_s2 + $0x10] sm:$0xff] }
 0xac1   : > { %v2150_v54 = vmul.f32 %v3140_v49, %v2136_v17  ;;  %vm2156_vm7 = vweird.f32 %v3140_v49  ;;  %2467 = vmatpush.msra.mxu1 %v2431_v25 }
 0xac2   : > { %3141 = vrsqrt.f32 %v2137_v50  ;;  %vm2157_vm9 = vmor %vm2155_vm8, %vm2156_vm7  ;;  %vm2165_vm11 = vweird.f32 %v2137_v50 }
 0xac3   : > { %v2151_v42 = vmul.f32 %v3140_v49, %v2150_v54  ;;  %3143 = vrcp.f32 %v3444_v37 }
 0xac5   : > { %v2152_v56 = vmul.f32 0.5, %v2151_v42  ;;  %v2429_v42 = vld [vmem:[%s3725_s2] sm:$0xff] }
 0xac6   : > { %v2130_v1 = vpop.xlane.xlu1 %2129 }
 0xac7   : > { %v2153_v59 = vsub.f32 1.5, %v2152_v56  ;;  %v2134_v51 = vmul.f32 %v2130_v1, %v4027_v48 }
 0xac8   : > { %v3142_v58 = vpop.eup %3141 }
 0xac9   : > { %v2154_v53 = vmul.f32 %v3140_v49, %v2153_v59  ;;  %v2160_v60 = vmul.f32 %v3142_v58, %v2137_v50  ;;  %v2138_v2 = vadd.f32 1e-05, %v2134_v51  ;;  %v3144_v63 = vpop.eup %3143  ;;  %vm2166_vm10 = vweird.f32 %v3142_v58  ;;  %v2430_v50 = vld [vmem:[%s3725_s2 + $0x8] sm:$0xff] }
 0xaca   : > { %vm2167_vm12 = vmor %vm2165_vm11, %vm2166_vm10  ;;  %v2251_v10 = vmul.f32 1.4142135, %v3144_v63  ;;  %vm2255_vm0 = vweird.f32 %v3144_v63  ;;  %2468 = vmatpush.msra.mxu1 %v2430_v50 }
 0xacb   : > { %v2158_v5 = vsel %vm2157_vm9, %v3140_v49, %v2154_v53  ;;  %v2161_v18 = vmul.f32 %v3142_v58, %v2160_v60  ;;  %3145 = vrsqrt.f32 %v2138_v2  ;;  %vm2175_vm14 = vweird.f32 %v2138_v2 }
 0xacc   : > { %v2180_v61 = vmul.f32 %v2158_v5, %v4048_v13  ;;  %v2252_v13 = vsub.f32 1.0, %v2251_v10  ;;  %2469 = vmatpush.msra.mxu1 %v2429_v42 }
 0xacd   : > { %v2162_v62 = vmul.f32 0.5, %v2161_v18 }
 0xace   : > { %v2187_v0 = vmul.f32 %v4068_v39, %v2180_v61  ;;  %v2253_v33 = vmul.f32 %v3144_v63, %v2252_v13 }
 0xacf   : > { %v2163_v4 = vsub.f32 1.5, %v2162_v62 }
 0xad0   : > { %v4087_v26 = vadd.f32 %v4073_v43, %v2187_v0  ;;  %v2254_v20 = vadd.f32 %v3144_v63, %v2253_v33 }
 0xad1   : > { %v3146_v6 = vpop.eup %3145  ;;  %v2164_v8 = vmul.f32 %v3142_v58, %v2163_v4 }
 0xad2   : > { %v2170_v9 = vmul.f32 %v3146_v6, %v2138_v2  ;;  %2907 = vmatmul.msk.f32.gmra.mxu2 %vm795_vm1, %v4087_v26  ;;  %vm2176_vm13 = vweird.f32 %v3146_v6  ;;  %v4110_v27 = vsel %vm2255_vm0, %v3144_v63, %v2254_v20 }
 0xad3   : > { %v2168_v3 = vsel %vm2167_vm12, %v3142_v58, %v2164_v8  ;;  %vm2177_vm15 = vmor %vm2175_vm14, %vm2176_vm13 }
 0xad4   : > { %v2171_v7 = vmul.f32 %v3146_v6, %v2170_v9  ;;  %v2181_v11 = vmul.f32 %v2168_v3, %v4055_v21  ;;  %v4104_v21 = vld [vmem:[%s749_s17] ss:$0 sm:$0xff] }
 0xad6   : > { %v2172_v12 = vmul.f32 0.5, %v2171_v7  ;;  %v2188_v29 = vmul.f32 %v4068_v39, %v2181_v11 }
 0xad8   : > { %v2173_v14 = vsub.f32 1.5, %v2172_v12  ;;  %v4094_v38 = vadd.f32 %v4073_v43, %v2188_v29 }
 0xada   : > { %v2174_v31 = vmul.f32 %v3146_v6, %v2173_v14  ;;  %2908 = vmatmul.msk.f32.gmra.mxu2 %vm795_vm1, %v4094_v38 }
 0xadc   : > { %v2178_v16 = vsel %vm2177_vm15, %v3146_v6, %v2174_v31 }
 0xadd   : > { %v2182_v19 = vmul.f32 %v2178_v16, %v4061_v35 }
 0xadf   : > { %v2189_v22 = vmul.f32 %v4068_v39, %v2182_v19 }
 0xae1   : > { %v4108_v24 = vadd.f32 %v4073_v43, %v2189_v22 }
 0xae2   : > { %v2234_v28 = vpop.f32.mrf.mxu2 }
 0xae3   : > { %v2235_v15 = vadd.f32 %v4104_v21, %v2234_v28  ;;  %2909 = vmatmul.msk.f32.gmra.mxu2 %vm795_vm1, %v4108_v24 }
 0xae5   : > { %v2257_v30 = vmul.f32 %v4110_v27, %v2235_v15  ;;  %v2246_v11 = vmul.f32 0.5, %v2235_v15 }
 0xae7   : > { %v2261_v35 = vmul.f32 %v2257_v30, %v2257_v30 }
 0xae9   : > { %v2262_v46 = vmin.f32 %v2261_v35, 16.0 }
 0xaeb   : > { %v2263_v55 = vmul.f32 2.1237322e-06, %v2262_v46  ;;  %v2274_v34 = vmul.f32 3.8918573e-05, %v2262_v46 }
 0xaed   : > { %v2264_v36 = vadd.f32 0.00028619796, %v2263_v55  ;;  %v2275_v39 = vadd.f32 0.001143296, %v2274_v34 }
 0xaef   : > { %v2265_v41 = vmul.f32 %v2264_v36, %v2262_v46  ;;  %v2276_v43 = vmul.f32 %v2275_v39, %v2262_v46 }
 0xaf1   : > { %v2277_v47 = vadd.f32 0.014752088, %v2276_v43  ;;  %v2266_v17 = vadd.f32 0.0036580483, %v2265_v41 }
 0xaf3   : > { %v2278_v52 = vmul.f32 %v2277_v47, %v2262_v46  ;;  %v2267_v54 = vmul.f32 %v2266_v17, %v2262_v46 }
 0xaf5   : > { %v2279_v49 = vadd.f32 0.112945676, %v2278_v52  ;;  %v2268_v59 = vadd.f32 0.05243302, %v2267_v54 }
 0xaf7   : > { %v2280_v56 = vmul.f32 %v2279_v49, %v2262_v46  ;;  %v2269_v37 = vmul.f32 %v2268_v59, %v2262_v46 }
 0xaf9   : > { %v2281_v1 = vadd.f32 0.4994258, %v2280_v56  ;;  %v2270_v53 = vadd.f32 0.18741608, %v2269_v37 }
 0xafb   : > { %v2282_v51 = vmul.f32 %v2281_v1, %v2262_v46  ;;  %v2271_v2 = vmul.f32 %v2270_v53, %v2262_v46 }
 0xafd   : > { %v2283_v58 = vadd.f32 1.0, %v2282_v51  ;;  %v2272_v62 = vadd.f32 1.1283791, %v2271_v2 }
 0xaff   : > { %3147 = vrcp.f32 %v2283_v58  ;;  %v2295_v61 = vand.u32 2147483648, %v2283_v58  ;;  %v2293_v0 = vand.u32 2147483647, %v2283_v58  ;;  %vm2289_vm3 = vweird.f32 %v2283_v58 }
 0xb00   : > { %v2273_v8 = vmul.f32 %v2272_v62, %v2257_v30 }
 0xb01   : > { %v2296_v6 = vor.u32 1.1754944e-38, %v2295_v61  ;;  %vm2294_vm5 = vcmp.eq.f32.partialorder %v2293_v0, 8.507059e+37 }
 0xb05   : > { %v3148_v60 = vpop.eup %3147 }
 0xb06   : > { %v2285_v5 = vmul.f32 %v3148_v60, %v2283_v58  ;;  %vm2290_vm2 = vweird.f32 %v3148_v60 }
 0xb07   : > { %vm2291_vm4 = vmor %vm2289_vm3, %vm2290_vm2 }
 0xb08   : > { %v2286_v18 = vsub.f32 1.0, %v2285_v5 }
 0xb0a   : > { %v2287_v63 = vmul.f32 %v3148_v60, %v2286_v18 }
 0xb0c   : > { %v2288_v4 = vadd.f32 %v3148_v60, %v2287_v63 }
 0xb0e   : > { %v2292_v9 = vsel %vm2291_vm4, %v3148_v60, %v2288_v4 }
 0xb0f   : > { %v2297_v10 = vsel %vm2294_vm5, %v2296_v6, %v2292_v9 }
 0xb10   : > { %v2298_v3 = vmul.f32 %v2297_v10, %v2273_v8 }
 0xb12   : > { %v2910_v7 = vclamps-f32 %v2298_v3, 1.0 }
 0xb14   : > { %v2421_v12 = vadd.f32 1.0, %v2910_v7 }
 0xb16   : > { %v2425_v29 = vmul.f32 %v2421_v12, %v2246_v11 }
 0xb18   : > { %2914 = vmatmul.msk.f32.vlgmr.msra.gmra.mxu1 %vm2441_vm6, %v2425_v29 }
 0xb55   : > { %v2237_v13 = vpop.f32.mrf.mxu2 }
 0xb56   : > { %v4126_v14 = vadd.f32 %v4104_v21, %v2237_v13 }
 0xb58   : > { %v4130_v31 = vmul.f32 %v4110_v27, %v4126_v14 }
 0xb5a   : > { %v2301_v33 = vmul.f32 %v4130_v31, %v4130_v31 }
 0xb5c   : > { %v2302_v16 = vmin.f32 %v2301_v33, 16.0 }
 0xb5d   : > { %v2240_v19 = vpop.f32.mrf.mxu2 }
 0xb5e   : > { %v2303_v20 = vmul.f32 2.1237322e-06, %v2302_v16  ;;  %v2314_v22 = vmul.f32 3.8918573e-05, %v2302_v16  ;;  %v4135_v28 = vadd.f32 %v4104_v21, %v2240_v19 }
 0xb60   : > { %v2304_v15 = vadd.f32 0.00028619796, %v2303_v20  ;;  %v2315_v30 = vadd.f32 0.001143296, %v2314_v22  ;;  %v4139_v35 = vmul.f32 %v4110_v27, %v4135_v28 }
 0xb62   : > { %v2305_v46 = vmul.f32 %v2304_v15, %v2302_v16  ;;  %v2316_v32 = vmul.f32 %v2315_v30, %v2302_v16  ;;  %v2341_v55 = vmul.f32 %v4139_v35, %v4139_v35 }
 0xb64   : > { %v2306_v34 = vadd.f32 0.0036580483, %v2305_v46  ;;  %v2317_v57 = vadd.f32 0.014752088, %v2316_v32  ;;  %v4143_v36 = vmin.f32 %v2341_v55, 16.0 }
 0xb66   : > { %v2318_v39 = vmul.f32 %v2317_v57, %v2302_v16  ;;  %v2343_v40 = vmul.f32 2.1237322e-06, %v4143_v36  ;;  %v2354_v41 = vmul.f32 3.8918573e-05, %v4143_v36  ;;  %v2243_v43 = vpop.f32.mrf.mxu2  ;;  %v2307_v47 = vmul.f32 %v2306_v34, %v2302_v16 }
 0xb67   : > { %v4148_v44 = vadd.f32 %v4104_v21, %v2243_v43 }
 0xb68   : > { %v2319_v23 = vadd.f32 0.112945676, %v2318_v39  ;;  %v2344_v17 = vadd.f32 0.00028619796, %v2343_v40  ;;  %v2355_v52 = vadd.f32 0.001143296, %v2354_v41 }
 0xb69   : > { %v4152_v25 = vmul.f32 %v4110_v27, %v4148_v44  ;;  %v2308_v56 = vadd.f32 0.05243302, %v2307_v47 }
 0xb6a   : > { %v2320_v49 = vmul.f32 %v2319_v23, %v2302_v16  ;;  %v2345_v50 = vmul.f32 %v2344_v17, %v4143_v36  ;;  %v2356_v54 = vmul.f32 %v2355_v52, %v4143_v36 }
 0xb6b   : > { %v2381_v42 = vmul.f32 %v4152_v25, %v4152_v25  ;;  %v2309_v60 = vmul.f32 %v2308_v56, %v2302_v16 }
 0xb6c   : > { %v2321_v1 = vadd.f32 0.4994258, %v2320_v49  ;;  %v2346_v21 = vadd.f32 0.0036580483, %v2345_v50  ;;  %v2357_v59 = vadd.f32 0.014752088, %v2356_v54 }
 0xb6d   : > { %v4158_v51 = vmin.f32 %v2381_v42, 16.0  ;;  %v2310_v4 = vadd.f32 0.18741608, %v2309_v60 }
 0xb6e   : > { %v2322_v58 = vmul.f32 %v2321_v1, %v2302_v16  ;;  %v2358_v37 = vmul.f32 %v2357_v59, %v4143_v36  ;;  %v2347_v5 = vmul.f32 %v2346_v21, %v4143_v36 }
 0xb6f   : > { %v2383_v27 = vmul.f32 2.1237322e-06, %v4158_v51  ;;  %v2394_v53 = vmul.f32 3.8918573e-05, %v4158_v51  ;;  %v2311_v12 = vmul.f32 %v2310_v4, %v2302_v16 }
 0xb70   : > { %v2323_v2 = vadd.f32 1.0, %v2322_v58  ;;  %v2359_v18 = vadd.f32 0.112945676, %v2358_v37  ;;  %v2348_v8 = vadd.f32 0.05243302, %v2347_v5 }
 0xb71   : > { %v2384_v61 = vadd.f32 0.00028619796, %v2383_v27  ;;  %v2395_v62 = vadd.f32 0.001143296, %v2394_v53  ;;  %v2312_v30 = vadd.f32 1.1283791, %v2311_v12 }
 0xb72   : > { %3149 = vrcp.f32 %v2323_v2  ;;  %v2360_v63 = vmul.f32 %v2359_v18, %v4143_v36  ;;  %v2349_v33 = vmul.f32 %v2348_v8, %v4143_v36  ;;  %v2335_v46 = vand.u32 2147483648, %v2323_v2 }
 0xb73   : > { %v2385_v0 = vmul.f32 %v2384_v61, %v4158_v51  ;;  %v2396_v6 = vmul.f32 %v2395_v62, %v4158_v51  ;;  %v2333_v34 = vand.u32 2147483647, %v2323_v2  ;;  %vm2329_vm8 = vweird.f32 %v2323_v2 }
 0xb74   : > { %v2361_v9 = vadd.f32 0.4994258, %v2360_v63  ;;  %v2350_v57 = vadd.f32 0.18741608, %v2349_v33  ;;  %v2336_v41 = vor.u32 1.1754944e-38, %v2335_v46  ;;  %v2313_v23 = vmul.f32 %v2312_v30, %v4130_v31 }
 0xb75   : > { %v2397_v10 = vadd.f32 0.014752088, %v2396_v6  ;;  %v2386_v7 = vadd.f32 0.0036580483, %v2385_v0  ;;  %vm2334_vm10 = vcmp.eq.f32.partialorder %v2333_v34, 8.507059e+37  ;;  %v2247_v31 = vmul.f32 0.5, %v4126_v14 }
 0xb76   : > { %v2362_v3 = vmul.f32 %v2361_v9, %v4143_v36  ;;  %v2351_v52 = vmul.f32 %v2350_v57, %v4143_v36  ;;  %v2248_v9 = vmul.f32 0.5, %v4135_v28 }
 0xb77   : > { %v2398_v29 = vmul.f32 %v2397_v10, %v4158_v51  ;;  %v2387_v15 = vmul.f32 %v2386_v7, %v4158_v51 }
 0xb78   : > { %v3150_v11 = vpop.eup %3149  ;;  %v2363_v19 = vadd.f32 1.0, %v2362_v3  ;;  %v2352_v21 = vadd.f32 1.1283791, %v2351_v52 }
 0xb79   : > { %v2325_v13 = vmul.f32 %v3150_v11, %v2323_v2  ;;  %v2399_v20 = vadd.f32 0.112945676, %v2398_v29  ;;  %vm2330_vm7 = vweird.f32 %v3150_v11  ;;  %v2388_v40 = vadd.f32 0.05243302, %v2387_v15 }
 0xb7a   : > { %3151 = vrcp.f32 %v2363_v19  ;;  %vm2331_vm9 = vmor %vm2329_vm8, %vm2330_vm7  ;;  %v2375_v59 = vand.u32 2147483648, %v2363_v19  ;;  %v2373_v37 = vand.u32 2147483647, %v2363_v19  ;;  %vm2369_vm12 = vweird.f32 %v2363_v19 }
 0xb7b   : > { %v2326_v22 = vsub.f32 1.0, %v2325_v13  ;;  %v2400_v32 = vmul.f32 %v2399_v20, %v4158_v51  ;;  %v2389_v42 = vmul.f32 %v2388_v40, %v4158_v51  ;;  %v2353_v5 = vmul.f32 %v2352_v21, %v4139_v35 }
 0xb7c   : > { %v2376_v2 = vor.u32 1.1754944e-38, %v2375_v59  ;;  %vm2374_vm14 = vcmp.eq.f32.partialorder %v2373_v37, 8.507059e+37 }
 0xb7d   : > { %v2327_v55 = vmul.f32 %v3150_v11, %v2326_v22  ;;  %v2401_v16 = vadd.f32 0.4994258, %v2400_v32  ;;  %v2390_v53 = vadd.f32 0.18741608, %v2389_v42  ;;  %v2249_v32 = vmul.f32 0.5, %v4148_v44 }
 0xb7f   : > { %v2328_v39 = vadd.f32 %v3150_v11, %v2327_v55  ;;  %v2402_v43 = vmul.f32 %v2401_v16, %v4158_v51  ;;  %v2391_v0 = vmul.f32 %v2390_v53, %v4158_v51  ;;  %v3068_v51 = vld [vmem:[%s757_s18] ss:$0 sm:$0xff] }
 0xb80   : > { %v3152_v47 = vpop.eup %3151 }
 0xb81   : > { %v2332_v17 = vsel %vm2331_vm9, %v3150_v11, %v2328_v39  ;;  %v2365_v50 = vmul.f32 %v3152_v47, %v2363_v19  ;;  %v2403_v56 = vadd.f32 1.0, %v2402_v43  ;;  %vm2370_vm11 = vweird.f32 %v3152_v47 }
 0xb82   : > { %v2337_v49 = vsel %vm2334_vm10, %v2336_v41, %v2332_v17  ;;  %vm2371_vm13 = vmor %vm2369_vm12, %vm2370_vm11  ;;  %v2392_v10 = vadd.f32 1.1283791, %v2391_v0 }
 0xb83   : > { %v2338_v54 = vmul.f32 %v2337_v49, %v2313_v23  ;;  %v2366_v1 = vsub.f32 1.0, %v2365_v50  ;;  %3153 = vrcp.f32 %v2403_v56  ;;  %v2415_v3 = vand.u32 2147483648, %v2403_v56 }
 0xb84   : > { %v2413_v35 = vand.u32 2147483647, %v2403_v56  ;;  %vm2409_vm0 = vweird.f32 %v2403_v56  ;;  %v2393_v33 = vmul.f32 %v2392_v10, %v4152_v25 }
 0xb85   : > { %v2367_v58 = vmul.f32 %v3152_v47, %v2366_v1  ;;  %v2911_v27 = vclamps-f32 %v2338_v54, 1.0  ;;  %v2416_v13 = vor.u32 1.1754944e-38, %v2415_v3  ;;  %v3070_v3 = vld [vmem:[%s4309_s11] ss:$0 sm:$0xff] }
 0xb86   : > { %vm2414_vm3 = vcmp.eq.f32.partialorder %v2413_v35, 8.507059e+37 }
 0xb87   : > { %v2368_v60 = vadd.f32 %v3152_v47, %v2367_v58  ;;  %v2422_v36 = vadd.f32 1.0, %v2911_v27 }
 0xb89   : > { %v2372_v18 = vsel %vm2371_vm13, %v3152_v47, %v2368_v60  ;;  %v2426_v61 = vmul.f32 %v2422_v36, %v2247_v31  ;;  %v3154_v62 = vpop.eup %3153 }
 0xb8a   : > { %v2377_v63 = vsel %vm2374_vm14, %v2376_v2, %v2372_v18  ;;  %v2405_v6 = vmul.f32 %v3154_v62, %v2403_v56  ;;  %vm2410_vm15 = vweird.f32 %v3154_v62 }
 0xb8b   : > { %v2378_v4 = vmul.f32 %v2377_v63, %v2353_v5  ;;  %2915 = vmatmul.msk.f32.gmra.mxu1 %vm2441_vm6, %v2426_v61  ;;  %vm2411_vm2 = vmor %vm2409_vm0, %vm2410_vm15 }
 0xb8c   : > { %v2406_v14 = vsub.f32 1.0, %v2405_v6 }
 0xb8d   : > { %v2912_v8 = vclamps-f32 %v2378_v4, 1.0 }
 0xb8e   : > { %v2407_v7 = vmul.f32 %v3154_v62, %v2406_v14 }
 0xb8f   : > { %v2423_v11 = vadd.f32 1.0, %v2912_v8 }
 0xb90   : > { %v2408_v12 = vadd.f32 %v3154_v62, %v2407_v7 }
 0xb91   : > { %v2427_v29 = vmul.f32 %v2423_v11, %v2248_v9  ;;  %v3069_v9 = vld [vmem:[%s760_s20] ss:$0 sm:$0xff] }
 0xb92   : > { %v2412_v19 = vsel %vm2411_vm2, %v3154_v62, %v2408_v12 }
 0xb93   : > { %2916 = vmatmul.msk.f32.gmra.mxu1 %vm2441_vm6, %v2427_v29  ;;  %v2417_v28 = vsel %vm2414_vm3, %v2416_v13, %v2412_v19 }
 0xb94   : > { %v2418_v22 = vmul.f32 %v2417_v28, %v2393_v33 }
 0xb95   : > { %v2471_v20 = vpop.f32.mrf.mxu1 }
 0xb96   : > { %v2472_v15 = vadd.f32 %v3068_v51, %v2471_v20  ;;  %v2913_v46 = vclamps-f32 %v2418_v22, 1.0 }
 0xb98   : > { %v2483_v30 = vadd.f32 %v2472_v15, %v4077_v45  ;;  %v2424_v34 = vadd.f32 1.0, %v2913_v46 }
 0xb9a   : > { %v2489_v55 = vsel %vm795_vm1, %v2483_v30, 0.0  ;;  %v2428_v57 = vmul.f32 %v2424_v34, %v2249_v32 }
 0xb9b   : > { %2490 = vadd.xlane.f32.xlu0 %v2489_v55 }
 0xb9c   : > { %2917 = vmatmul.msk.f32.gmra.mxu1 %vm2441_vm6, %v2428_v57 }
 0xc08   : > { %v2474_v25 = vpop.f32.mrf.mxu1 }
 0xc09   : > { %v2475_v16 = vadd.f32 %v3068_v51, %v2474_v25 }
 0xc0b   : > { %v2484_v39 = vadd.f32 %v2475_v16, %v4087_v26 }
 0xc0d   : > { %v2492_v41 = vsel %vm795_vm1, %v2484_v39, 0.0 }
 0xc0e   : > { %v2491_v40 = vpop.xlane.xlu0 %2490  ;;  %2493 = vadd.xlane.f32.xlu2 %v2492_v41 }
 0xc0f   : > { %v2501_v43 = vmul.f32 %v2491_v40, %v4027_v48 }
 0xc10   : > { %v2477_v47 = vpop.f32.mrf.mxu1 }
 0xc11   : > { %v2505_v45 = vsub.f32 %v2483_v30, %v2501_v43  ;;  %v2478_v44 = vadd.f32 %v3068_v51, %v2477_v47 }
 0xc13   : > { %v2509_v23 = vmul.f32 %v2505_v45, %v2505_v45  ;;  %v2485_v17 = vadd.f32 %v2478_v44, %v4094_v38 }
 0xc15   : > { %v2513_v52 = vsel %vm795_vm1, %v2509_v23, 0.0  ;;  %v2495_v49 = vsel %vm795_vm1, %v2485_v17, 0.0 }
 0xc16   : > { %2496 = vadd.xlane.f32.xlu1 %v2495_v49  ;;  %2514 = vadd.xlane.f32.xlu2 %v2513_v52 }
 0xc19   : > { %v2480_v50 = vpop.f32.mrf.mxu1 }
 0xc1a   : > { %v2481_v26 = vadd.f32 %v3068_v51, %v2480_v50 }
 0xc1c   : > { %v2486_v54 = vadd.f32 %v2481_v26, %v4108_v24 }
 0xc1e   : > { %v2498_v42 = vsel %vm795_vm1, %v2486_v54, 0.0 }
 0xc1f   : > { %2499 = vadd.xlane.f32.xlu0 %v2498_v42 }
 0xc81   : > { %v2494_v56 = vpop.xlane.xlu2 %2493 }
 0xc82   : > { %v2502_v1 = vmul.f32 %v2494_v56, %v4027_v48 }
 0xc84   : > { %v2506_v21 = vsub.f32 %v2484_v39, %v2502_v1 }
 0xc86   : > { %v2510_v59 = vmul.f32 %v2506_v21, %v2506_v21 }
 0xc88   : > { %v2516_v38 = vsel %vm795_vm1, %v2510_v59, 0.0 }
 0xc89   : > { %2517 = vadd.xlane.f32.xlu1 %v2516_v38  ;;  %v2515_v58 = vpop.xlane.xlu2 %2514  ;;  %v2497_v37 = vpop.xlane.xlu1 %2496 }
 0xc8a   : > { %v2525_v27 = vmul.f32 %v2515_v58, %v4027_v48  ;;  %v2503_v53 = vmul.f32 %v2497_v37, %v4027_v48 }
 0xc8c   : > { %v2529_v31 = vadd.f32 1e-05, %v2525_v27  ;;  %v4204_v60 = vsub.f32 %v2485_v17, %v2503_v53 }
 0xc8e   : > { %3155 = vrsqrt.f32 %v2529_v31  ;;  %v2511_v24 = vmul.f32 %v4204_v60, %v4204_v60  ;;  %vm2539_vm5 = vweird.f32 %v2529_v31 }
 0xc90   : > { %v2519_v36 = vsel %vm795_vm1, %v2511_v24, 0.0 }
 0xc91   : > { %2520 = vadd.xlane.f32.xlu0 %v2519_v36 }
 0xc92   : > { %v2500_v2 = vpop.xlane.xlu0 %2499 }
 0xc93   : > { %v2504_v18 = vmul.f32 %v2500_v2, %v4027_v48 }
 0xc94   : > { %v3156_v5 = vpop.eup %3155 }
 0xc95   : > { %v2534_v61 = vmul.f32 %v3156_v5, %v2529_v31  ;;  %v4210_v62 = vsub.f32 %v2486_v54, %v2504_v18  ;;  %vm2540_vm4 = vweird.f32 %v3156_v5 }
 0xc96   : > { %vm2541_vm6 = vmor %vm2539_vm5, %vm2540_vm4 }
 0xc97   : > { %v2535_v63 = vmul.f32 %v3156_v5, %v2534_v61  ;;  %v2512_v0 = vmul.f32 %v4210_v62, %v4210_v62 }
 0xc99   : > { %v2536_v4 = vmul.f32 0.5, %v2535_v63  ;;  %v2522_v6 = vsel %vm795_vm1, %v2512_v0, 0.0 }
 0xc9a   : > { %2523 = vadd.xlane.f32.xlu2 %v2522_v6 }
 0xc9b   : > { %v2537_v14 = vsub.f32 1.5, %v2536_v4 }
 0xc9d   : > { %v2538_v8 = vmul.f32 %v3156_v5, %v2537_v14 }
 0xc9f   : > { %v2542_v10 = vsel %vm2541_vm6, %v3156_v5, %v2538_v8 }
 0xca0   : > { %v2573_v7 = vmul.f32 %v2542_v10, %v2505_v45 }
 0xca2   : > { %v2580_v35 = vmul.f32 %v3069_v9, %v2573_v7 }
 0xca4   : > { %v2587_v11 = vadd.f32 %v3070_v3, %v2580_v35 }
 0xca6   : > { %2591 = vst.msk [vmem:[#allocation2] sm:$0xff] %vm795_vm1, %v2587_v11 }
 0xcfc   : > { %v2518_v12 = vpop.xlane.xlu1 %2517 }
 0xcfd   : > { %v2526_v29 = vmul.f32 %v2518_v12, %v4027_v48 }
 0xcff   : > { %v2530_v51 = vadd.f32 1e-05, %v2526_v29 }
 0xd01   : > { %3157 = vrsqrt.f32 %v2530_v51  ;;  %vm2549_vm8 = vweird.f32 %v2530_v51 }
 0xd04   : > { %v2521_v13 = vpop.xlane.xlu0 %2520 }
 0xd05   : > { %v2527_v33 = vmul.f32 %v2521_v13, %v4027_v48 }
 0xd07   : > { %v3158_v19 = vpop.eup %3157  ;;  %v2531_v28 = vadd.f32 1e-05, %v2527_v33 }
 0xd08   : > { %v2544_v20 = vmul.f32 %v3158_v19, %v2530_v51  ;;  %vm2550_vm7 = vweird.f32 %v3158_v19 }
 0xd09   : > { %3159 = vrsqrt.f32 %v2531_v28  ;;  %vm2551_vm9 = vmor %vm2549_vm8, %vm2550_vm7  ;;  %vm2559_vm11 = vweird.f32 %v2531_v28 }
 0xd0a   : > { %v2545_v22 = vmul.f32 %v3158_v19, %v2544_v20 }
 0xd0c   : > { %v2546_v15 = vmul.f32 0.5, %v2545_v22 }
 0xd0d   : > { %v2524_v46 = vpop.xlane.xlu2 %2523 }
 0xd0e   : > { %v2547_v30 = vsub.f32 1.5, %v2546_v15  ;;  %v2528_v55 = vmul.f32 %v2524_v46, %v4027_v48 }
 0xd0f   : > { %v3160_v32 = vpop.eup %3159 }
 0xd10   : > { %v2548_v34 = vmul.f32 %v3158_v19, %v2547_v30  ;;  %v2554_v57 = vmul.f32 %v3160_v32, %v2531_v28  ;;  %v2532_v25 = vadd.f32 1e-05, %v2528_v55  ;;  %vm2560_vm10 = vweird.f32 %v3160_v32 }
 0xd11   : > { %vm2561_vm12 = vmor %vm2559_vm11, %vm2560_vm10 }
 0xd12   : > { %v2552_v16 = vsel %vm2551_vm9, %v3158_v19, %v2548_v34  ;;  %v2555_v39 = vmul.f32 %v3160_v32, %v2554_v57  ;;  %3161 = vrsqrt.f32 %v2532_v25  ;;  %vm2569_vm14 = vweird.f32 %v2532_v25 }
 0xd13   : > { %v2574_v40 = vmul.f32 %v2552_v16, %v2506_v21 }
 0xd14   : > { %v2556_v41 = vmul.f32 0.5, %v2555_v39 }
 0xd15   : > { %v2581_v43 = vmul.f32 %v3069_v9, %v2574_v40 }
 0xd16   : > { %v2557_v45 = vsub.f32 1.5, %v2556_v41 }
 0xd17   : > { %v2588_v47 = vadd.f32 %v3070_v3, %v2581_v43 }
 0xd18   : > { %v2558_v44 = vmul.f32 %v3160_v32, %v2557_v45  ;;  %v3162_v23 = vpop.eup %3161 }
 0xd19   : > { %2592 = vst.msk [vmem:[#allocation2 + $0x8] sm:$0xff] %vm795_vm1, %v2588_v47  ;;  %v2564_v17 = vmul.f32 %v3162_v23, %v2532_v25  ;;  %vm2570_vm13 = vweird.f32 %v3162_v23 }
 0xd1a   : > { %v2562_v48 = vsel %vm2561_vm12, %v3160_v32, %v2558_v44  ;;  %vm2571_vm15 = vmor %vm2569_vm14, %vm2570_vm13 }
 0xd1b   : > { %v2575_v52 = vmul.f32 %v2562_v48, %v4204_v60  ;;  %v2565_v49 = vmul.f32 %v3162_v23, %v2564_v17 }
 0xd1d   : > { %v2582_v50 = vmul.f32 %v3069_v9, %v2575_v52  ;;  %v2566_v26 = vmul.f32 0.5, %v2565_v49 }
 0xd1f   : > { %v2589_v54 = vadd.f32 %v3070_v3, %v2582_v50  ;;  %v2567_v42 = vsub.f32 1.5, %v2566_v26 }
 0xd21   : > { %2593 = vst.msk [vmem:[#allocation2 + $0x10] sm:$0xff] %vm795_vm1, %v2589_v54  ;;  %v2568_v56 = vmul.f32 %v3162_v23, %v2567_v42 }
 0xd23   : > { %v2572_v1 = vsel %vm2571_vm15, %v3162_v23, %v2568_v56 }
 0xd24   : > { %v2576_v21 = vmul.f32 %v2572_v1, %v4210_v62 }
 0xd26   : > { %v2583_v59 = vmul.f32 %v3069_v9, %v2576_v21  ;;  %2598 = sbr.rel (%p2918_p4) target bundleno = 3375 (0xd2f), region = 112 }
 0xd28   : > { %v2590_v38 = vadd.f32 %v3070_v3, %v2583_v59 }
 0xd2a   : > { %2594 = vst.msk [vmem:[#allocation2 + $0x18] sm:$0xff] %vm795_vm1, %v2590_v38 }
 0xd2b   : > { %2599 = vst.msk [vmem:[#allocation14] sm:$0xff] %vm795_vm1, %v2587_v11 }
 0xd2c   : > { %2600 = vst.msk [vmem:[#allocation14 + $0x8] sm:$0xff] %vm795_vm1, %v2588_v47 }
 0xd2d   : > { %2601 = vst.msk [vmem:[#allocation14 + $0x10] sm:$0xff] %vm795_vm1, %v2589_v54 }
 0xd2e   : > { %2602 = vst.msk [vmem:[#allocation14 + $0x18] sm:$0xff] %vm795_vm1, %v2590_v38 }
 0xd2f PF: > { %p2977_p5 = scmp.eq.s32.totalorder %s3547_s22, 1  ;;  %s3445_s26 = smov [#allocation14]  }
 0xd30   : > { %s2608_s7 = sshll.u32 %s3445_s26, 4  ;;  %s4310_s15 = sld [smem:[#allocation34_spill]]  ;;  %s2609_s7 = int_to_ptr.vmem [resolvable:$true] %s2608_s7 }
 0xd31   : > { %s3446_s28 = smov 128   ;;  %s3447_s25 = smov 8  }
 0xd36   : > { %s2610_s21 = sshll.u32 %s4310_s15, 4  ;;  %s2611_s21 = int_to_ptr.hbm [resolvable:$true] %s2610_s21 }
 0xd37   : > { %2947 = dma.vmem_to_hbm [thread:$0]  (%p2977_p5), %s2609_s7, 512, %s2611_s21, [#allocation5], %s3446_s28, %s3446_s28, %s3447_s25  }
 0xd38   : > { %3406 = dma.done.wait (%p2977_p5), [#allocation5], 512  }
 0xd39   : > { %3408 = vsyncadd (%p2977_p5), [#allocation5], 4294966784 }
 0xd3a PF: > { %s4311_s21 = sld [smem:[#allocation21_spill]]  ;;  %s4314_s18 = smov %s3415_s19 }
 0xd3b   : > { %s4312_s10 = sld [smem:[#allocation20_spill]] }
 0xd3c   : > { %s4313_s20 = sld [smem:[#allocation22_spill]] }
 0xd40   : > { %p31_p6 = scmp.ge.s32.totalorder %s4311_s21, 4  }
 0xd41   : > { %s4315_s19 = smov %s4312_s10 }
 0xd42   :  { %33 = sbr.rel (!%p31_p6) target bundleno = 21 (0x15), region = 189 }
 0xd47   :  { %2627 = vsyncpa [#allocation4], 1 }
 0xd48   :  { %2629 = vsyncpa [#allocation4 + $0x1], 1 }
 0xd49   :  { %2630 = vsyncpa [#allocation7], 1 }
 0xd4a   :  { %2631 = vsyncpa [#allocation10], 1 }
 0xd4b   :  { %2633 = vsyncpa [#allocation10 + $0x1], 1 }
 0xd4c   :  { %2634 = vsyncpa [#allocation13], 1 }
 0xd4d   :  { %2636 = vsyncpa [#allocation13 + $0x1], 1 }
 0xd4e   :  { %2637 = vsyncpa [#allocation5], 1 }
 0xd4f   :  { %2639 = vsyncpa [#allocation5 + $0x1], 1 }

</bundles_post_ra>
